<compile_context>
chip_gen: v5e
topology: v5e:2x2
jax: 0.10.0
libtpu: 0.0.40
codegen_flags: <defaults>
</compile_context>

<pallas_src>
import functools

import jax
import jax.numpy as jnp
import numpy as np
from jax.experimental import pallas as pl
from jax.experimental.pallas import tpu as pltpu

# ---------------- small synthetic config ----------------
B = 2                 # batch
C_IN = 3              # input channels
IMG_H, IMG_W = 16, 32
PATCH = 8             # synthetic backbone: 8x8 / stride-8 patch conv (~ out_indices=(2,))
CNN_OUT = 16          # model_kwargs.cnn_output_size
RNN_FEAT = 16         # model_kwargs.rnn_features_num (gate output channels)
H_FEAT, W_FEAT = IMG_H // PATCH, IMG_W // PATCH     # feature map 2 x 4
RNN_IN = H_FEAT * RNN_FEAT                          # GRU input size
RNN_HIDDEN = 32       # model_kwargs.rnn_hidden_size
NUM_CLASSES = 11      # model_kwargs.num_classes
C_PAD = 128           # lane-dense padded class axis (sliced back to NUM_CLASSES)
# rnn_bidirectional=True, rnn_num_layers=1, rnn_dropout irrelevant at inference


# ---------------- the single fused Pallas kernel ----------------
def _crnn_fused_kernel(
    patches_ref,   # (T*B, Hf*Cin*P*P)            rows ordered (w, b)
    bw_ref,        # (Hf*Cin*P*P, Hf*CNN_OUT)     block-diag backbone weight
    bb_ref,        # (1, Hf*CNN_OUT)
    gw_ref,        # (Hf*CNN_OUT, Hf*RNN_FEAT)    block-diag 1x1 gate weight (bias=False)
    wih_ref,       # (Hf*RNN_FEAT, 6H)            [fwd r|z|n | bwd r|z|n]
    bih_ref,       # (1, 6H)
    whh_ref,       # (6, H, H)                    per-(direction, gate) W_hh^T
    bhh_ref,       # (6, 1, H)
    fcw_ref,       # (2, H, C_PAD)                fc weight split fwd/bwd, classes padded
    fcb_ref,       # (1, C_PAD)                   padded classes carry -1e30
    o_ref,         # (T*B, C_PAD)                 log-probs (lane-dense)
    xg_ref,        # scratch (6, T*B, H)          input-projection per (dir, gate)
    rnn_ref,       # scratch (2, T*B, H)          fwd / bwd GRU outputs
    h_ref,         # scratch (2, B, H)            hidden states
    *, T, B, H,
):
    # ---- backbone patch-conv (+ReLU) and 1x1 gate as plain matmuls ----
    feat = jnp.dot(patches_ref[...], bw_ref[...], preferred_element_type=jnp.float32) + bb_ref[...]
    feat = jnp.maximum(feat, 0.0)
    # rows (t=w, b), features (h, c)  ==  PyTorch permute(3,0,2,1).reshape(W,B,H*C)
    seq = jnp.dot(feat, gw_ref[...], preferred_element_type=jnp.float32)       # (T*B, F)

    # ---- both GRU directions' input projections in ONE matmul ----
    xg_all = jnp.dot(seq, wih_ref[...], preferred_element_type=jnp.float32) + bih_ref[...]
    for g in range(6):                              # gate split hoisted out of the time loop
        xg_ref[g] = xg_all[:, g * H:(g + 1) * H]

    whh = [whh_ref[g] for g in range(6)]            # (H, H) each, loop-invariant
    bhh = [bhh_ref[g] for g in range(6)]            # (1, H) each

    def cell(h, xr, xz, xn, base):
        hr = jnp.dot(h, whh[base + 0], preferred_element_type=jnp.float32) + bhh[base + 0]
        hz = jnp.dot(h, whh[base + 1], preferred_element_type=jnp.float32) + bhh[base + 1]
        hn = jnp.dot(h, whh[base + 2], preferred_element_type=jnp.float32) + bhh[base + 2]
        r = jax.nn.sigmoid(xr + hr)
        z = jax.nn.sigmoid(xz + hz)
        n = jnp.tanh(xn + r * hn)
        return (1.0 - z) * n + z * h

    h_ref[...] = jnp.zeros_like(h_ref)

    # ---- both GRU recurrences interleaved in one unrolled in-kernel loop ----
    def step(t, carry):
        rf = pl.multiple_of(t * B, B)               # forward direction: time t
        rb = pl.multiple_of((T - 1 - t) * B, B)     # backward direction: time T-1-t
        h_f = cell(h_ref[0],
                   xg_ref[0, pl.ds(rf, B), :],
                   xg_ref[1, pl.ds(rf, B), :],
                   xg_ref[2, pl.ds(rf, B), :], 0)
        h_ref[0] = h_f
        rnn_ref[0, pl.ds(rf, B), :] = h_f
        h_b = cell(h_ref[1],
                   xg_ref[3, pl.ds(rb, B), :],
                   xg_ref[4, pl.ds(rb, B), :],
                   xg_ref[5, pl.ds(rb, B), :], 3)
        h_ref[1] = h_b
        rnn_ref[1, pl.ds(rb, B), :] = h_b
        return carry

    jax.lax.fori_loop(0, T, step, 0, unroll=True)

    # ---- fc + log-softmax over a lane-dense 128-padded class axis ----
    logits = (jnp.dot(rnn_ref[0], fcw_ref[0], preferred_element_type=jnp.float32)
              + jnp.dot(rnn_ref[1], fcw_ref[1], preferred_element_type=jnp.float32)
              + fcb_ref[...])
    m = jnp.max(logits, axis=-1, keepdims=True)
    lse = m + jnp.log(jnp.sum(jnp.exp(logits - m), axis=-1, keepdims=True))
    o_ref[...] = (logits - lse).astype(o_ref.dtype)


# ---------------- forward pass (wrapper: layout + weight packing only) ----------------
def crnn_forward(x, p):
    bsz = x.shape[0]
    T = W_FEAT
    K = C_IN * PATCH * PATCH
    H = RNN_HIDDEN

    # im2col with rows ordered (w, b) and features (h, cin, ph, pw): the backbone /
    # gate matmuls then directly yield the (W, B, H*C) sequence — no transposes later.
    patches = x.reshape(bsz, C_IN, H_FEAT, PATCH, W_FEAT, PATCH)
    patches = patches.transpose(4, 0, 2, 1, 3, 5).reshape(T * bsz, H_FEAT * K)

    # ---- weight-only packing (tiny; constant-folded under jit) ----
    bw_block = jnp.zeros((H_FEAT * K, H_FEAT * CNN_OUT), jnp.float32)
    gw_block = jnp.zeros((H_FEAT * CNN_OUT, H_FEAT * RNN_FEAT), jnp.float32)
    for h in range(H_FEAT):
        bw_block = bw_block.at[h * K:(h + 1) * K, h * CNN_OUT:(h + 1) * CNN_OUT].set(p["backbone_w"])
        gw_block = gw_block.at[h * CNN_OUT:(h + 1) * CNN_OUT,
                               h * RNN_FEAT:(h + 1) * RNN_FEAT].set(p["gate_w"])
    bb_tile = jnp.tile(p["backbone_b"], H_FEAT).reshape(1, H_FEAT * CNN_OUT)

    wih_cat = jnp.concatenate([p["w_ih_f"].T, p["w_ih_b"].T], axis=1)            # (F, 6H)
    bih_cat = jnp.concatenate([p["b_ih_f"], p["b_ih_b"]]).reshape(1, 6 * H)

    def gates_T(w):  # (3H, H) -> (3, H, H) of per-gate W^T
        return jnp.stack([w[g * H:(g + 1) * H, :].T for g in range(3)], axis=0)

    whh_stack = jnp.concatenate([gates_T(p["w_hh_f"]), gates_T(p["w_hh_b"])], axis=0)   # (6,H,H)
    bhh_stack = jnp.concatenate([p["b_hh_f"], p["b_hh_b"]]).reshape(6, 1, H)

    fcw_pad = jnp.zeros((2, H, C_PAD), jnp.float32)
    fcw_pad = fcw_pad.at[0, :, :NUM_CLASSES].set(p["fc_w"].T[:H])
    fcw_pad = fcw_pad.at[1, :, :NUM_CLASSES].set(p["fc_w"].T[H:])
    fcb_pad = jnp.full((1, C_PAD), -1e30, jnp.float32).at[0, :NUM_CLASSES].set(p["fc_b"])

    out = pl.pallas_call(
        functools.partial(_crnn_fused_kernel, T=T, B=bsz, H=H),
        out_shape=jax.ShapeDtypeStruct((T * bsz, C_PAD), jnp.float32),
        scratch_shapes=[
            pltpu.VMEM((6, T * bsz, H), jnp.float32),   # xg per (direction, gate)
            pltpu.VMEM((2, T * bsz, H), jnp.float32),   # fwd / bwd GRU outputs
            pltpu.VMEM((2, bsz, H), jnp.float32),       # hidden states
        ],
        compiler_params=pltpu.CompilerParams(vmem_limit_bytes=32 * 1024 * 1024),
    )(patches.astype(jnp.float32), bw_block, bb_tile, gw_block,
      wih_cat, bih_cat, whh_stack, bhh_stack, fcw_pad, fcb_pad)

    return out[:, :NUM_CLASSES].reshape(T, bsz, NUM_CLASSES)


# ---------------- pure-JAX reference (PyTorch semantics, for correctness check) ----------------
def ref_forward(x, p):
    bsz = x.shape[0]
    patches = x.reshape(bsz, C_IN, H_FEAT, PATCH, W_FEAT, PATCH)
    patches = patches.transpose(0, 2, 4, 1, 3, 5).reshape(bsz * H_FEAT * W_FEAT, -1)
    feat = jnp.maximum(patches @ p["backbone_w"] + p["backbone_b"], 0.0)
    feat = feat.reshape(bsz, H_FEAT, W_FEAT, CNN_OUT)
    gated = (feat.reshape(-1, CNN_OUT) @ p["gate_w"]).reshape(bsz, H_FEAT, W_FEAT, RNN_FEAT)
    seq = gated.transpose(0, 3, 1, 2).transpose(3, 0, 2, 1).reshape(W_FEAT, bsz, H_FEAT * RNN_FEAT)

    def gru_dir(xs, w_ih, w_hh, b_ih, b_hh):
        hid = w_hh.shape[1]

        def step(h, xt):
            gi = xt @ w_ih.T + b_ih
            gh = h @ w_hh.T + b_hh
            r = jax.nn.sigmoid(gi[:, :hid] + gh[:, :hid])
            z = jax.nn.sigmoid(gi[:, hid:2 * hid] + gh[:, hid:2 * hid])
            n = jnp.tanh(gi[:, 2 * hid:] + r * gh[:, 2 * hid:])
            h_new = (1.0 - z) * n + z * h
            return h_new, h_new

        h0 = jnp.zeros((xs.shape[1], hid), jnp.float32)
        _, out = jax.lax.scan(step, h0, xs)
        return out

    fwd = gru_dir(seq, p["w_ih_f"], p["w_hh_f"], p["b_ih_f"], p["b_hh_f"])
    bwd = gru_dir(seq[::-1], p["w_ih_b"], p["w_hh_b"], p["b_ih_b"], p["b_hh_b"])[::-1]
    rnn_out = jnp.concatenate([fwd, bwd], axis=-1)
    logits = rnn_out @ p["fc_w"].T + p["fc_b"]
    return jax.nn.log_softmax(logits, axis=2)


# ---------------- deterministic parameter init ----------------
def init_params(key):
    def uni(k, shape, fan_in):
        bound = 1.0 / np.sqrt(fan_in)
        return jax.random.uniform(k, shape, jnp.float32, -bound, bound)

    ks = jax.random.split(key, 14)
    hid3 = 3 * RNN_HIDDEN
    return {
        "backbone_w": uni(ks[0], (C_IN * PATCH * PATCH, CNN_OUT), C_IN * PATCH * PATCH),
        "backbone_b": uni(ks[1], (CNN_OUT,), C_IN * PATCH * PATCH),
        "gate_w": uni(ks[2], (CNN_OUT, RNN_FEAT), CNN_OUT),              # 1x1 conv, bias=False
        "w_ih_f": uni(ks[3], (hid3, RNN_IN), RNN_HIDDEN),
        "w_hh_f": uni(ks[4], (hid3, RNN_HIDDEN), RNN_HIDDEN),
        "b_ih_f": uni(ks[5], (hid3,), RNN_HIDDEN),
        "b_hh_f": uni(ks[6], (hid3,), RNN_HIDDEN),
        "w_ih_b": uni(ks[7], (hid3, RNN_IN), RNN_HIDDEN),
        "w_hh_b": uni(ks[8], (hid3, RNN_HIDDEN), RNN_HIDDEN),
        "b_ih_b": uni(ks[9], (hid3,), RNN_HIDDEN),
        "b_hh_b": uni(ks[10], (hid3,), RNN_HIDDEN),
        "fc_w": uni(ks[11], (NUM_CLASSES, 2 * RNN_HIDDEN), 2 * RNN_HIDDEN),
        "fc_b": uni(ks[12], (NUM_CLASSES,), 2 * RNN_HIDDEN),
    }


if __name__ == "__main__":
    key = jax.random.PRNGKey(0)
    k_x, k_p = jax.random.split(key)
    x = jax.random.normal(k_x, (B, C_IN, IMG_H, IMG_W), jnp.float32)     # NCHW
    params = init_params(k_p)

    out = jax.block_until_ready(jax.jit(crnn_forward)(x, params))        # (W_FEAT, B, NUM_CLASSES)
    ref = jax.block_until_ready(ref_forward(x, params))

    assert out.shape == (W_FEAT, B, NUM_CLASSES), out.shape
    np.testing.assert_allclose(np.asarray(out), np.asarray(ref), rtol=2e-3, atol=2e-3)
    print("KERNEL_OK")
</pallas_src>

<mosaic_0001>
module attributes {stable_mosaic.version = 11 : i64} {
  func.func @_crnn_fused_kernel(%arg0: memref<8x384xf32, #tpu.memory_space<vmem>>, %arg1: memref<384x32xf32, #tpu.memory_space<vmem>>, %arg2: memref<1x32xf32, #tpu.memory_space<vmem>>, %arg3: memref<32x32xf32, #tpu.memory_space<vmem>>, %arg4: memref<32x192xf32, #tpu.memory_space<vmem>>, %arg5: memref<1x192xf32, #tpu.memory_space<vmem>>, %arg6: memref<6x32x32xf32, #tpu.memory_space<vmem>>, %arg7: memref<6x1x32xf32, #tpu.memory_space<vmem>>, %arg8: memref<2x32x128xf32, #tpu.memory_space<vmem>>, %arg9: memref<1x128xf32, #tpu.memory_space<vmem>>, %arg10: memref<8x128xf32, #tpu.memory_space<vmem>>, %arg11: memref<6x8x32xf32, #tpu.memory_space<vmem>>, %arg12: memref<2x8x32xf32, #tpu.memory_space<vmem>>, %arg13: memref<2x2x32xf32, #tpu.memory_space<vmem>>) attributes {dimension_semantics = [], scalar_prefetch = 0 : i64, scratch_operands = 3 : i64, tpu.core_type = #tpu.core_type<tc>} {
    %c0 = arith.constant 0 : index
    %c0_0 = arith.constant 0 : index
    %0 = vector.load %arg0[%c0, %c0_0] : memref<8x384xf32, #tpu.memory_space<vmem>>, vector<8x384xf32>
    %c0_1 = arith.constant 0 : index
    %c0_2 = arith.constant 0 : index
    %1 = vector.load %arg1[%c0_1, %c0_2] : memref<384x32xf32, #tpu.memory_space<vmem>>, vector<384x32xf32>
    %cst = arith.constant dense<0.000000e+00> : vector<8x32xf32>
    %2 = tpu.matmul %0, %1, %cst {dimension_numbers = #tpu.dot_dimension_numbers<[1], [0], [0], [1], [0, 0, 1, 1], [], []>} : vector<8x384xf32>, vector<384x32xf32>, vector<8x32xf32> -> vector<8x32xf32>
    %c0_3 = arith.constant 0 : index
    %c0_4 = arith.constant 0 : index
    %3 = vector.load %arg2[%c0_3, %c0_4] : memref<1x32xf32, #tpu.memory_space<vmem>>, vector<1x32xf32>
    %4 = vector.broadcast %3 : vector<1x32xf32> to vector<8x32xf32>
    %5 = arith.addf %2, %4 : vector<8x32xf32>
    %cst_5 = arith.constant 0.000000e+00 : f32
    %6 = vector.broadcast %cst_5 : f32 to vector<8x32xf32>
    %7 = arith.maximumf %5, %6 : vector<8x32xf32>
    %c0_6 = arith.constant 0 : index
    %c0_7 = arith.constant 0 : index
    %8 = vector.load %arg3[%c0_6, %c0_7] : memref<32x32xf32, #tpu.memory_space<vmem>>, vector<32x32xf32>
    %cst_8 = arith.constant dense<0.000000e+00> : vector<8x32xf32>
    %9 = tpu.matmul %7, %8, %cst_8 {dimension_numbers = #tpu.dot_dimension_numbers<[1], [0], [0], [1], [0, 0, 1, 1], [], []>} : vector<8x32xf32>, vector<32x32xf32>, vector<8x32xf32> -> vector<8x32xf32>
    %c0_9 = arith.constant 0 : index
    %c0_10 = arith.constant 0 : index
    %10 = vector.load %arg4[%c0_9, %c0_10] : memref<32x192xf32, #tpu.memory_space<vmem>>, vector<32x192xf32>
    %cst_11 = arith.constant dense<0.000000e+00> : vector<8x192xf32>
    %11 = tpu.matmul %9, %10, %cst_11 {dimension_numbers = #tpu.dot_dimension_numbers<[1], [0], [0], [1], [0, 0, 1, 1], [], []>} : vector<8x32xf32>, vector<32x192xf32>, vector<8x192xf32> -> vector<8x192xf32>
    %c0_12 = arith.constant 0 : index
    %c0_13 = arith.constant 0 : index
    %12 = vector.load %arg5[%c0_12, %c0_13] : memref<1x192xf32, #tpu.memory_space<vmem>>, vector<1x192xf32>
    %13 = vector.broadcast %12 : vector<1x192xf32> to vector<8x192xf32>
    %14 = arith.addf %11, %13 : vector<8x192xf32>
    %15 = vector.extract_strided_slice %14 {offsets = [0, 0], sizes = [8, 32], strides = [1, 1]} : vector<8x192xf32> to vector<8x32xf32>
    %c0_14 = arith.constant 0 : index
    %c0_15 = arith.constant 0 : index
    %c0_16 = arith.constant 0 : index
    %16 = vector.load %arg11[%c0_14, %c0_15, %c0_16] : memref<6x8x32xf32, #tpu.memory_space<vmem>>, vector<1x8x32xf32>
    %17 = vector.shape_cast %16 : vector<1x8x32xf32> to vector<8x32xf32>
    %18 = vector.shape_cast %15 : vector<8x32xf32> to vector<1x8x32xf32>
    tpu.vector_store %arg11[%c0_14, %c0_15, %c0_16], %18 {strides = array<i32>} : memref<6x8x32xf32, #tpu.memory_space<vmem>>, vector<1x8x32xf32>,
    %19 = vector.extract_strided_slice %14 {offsets = [0, 32], sizes = [8, 32], strides = [1, 1]} : vector<8x192xf32> to vector<8x32xf32>
    %c1 = arith.constant 1 : index
    %c0_17 = arith.constant 0 : index
    %c0_18 = arith.constant 0 : index
    %20 = vector.load %arg11[%c1, %c0_17, %c0_18] : memref<6x8x32xf32, #tpu.memory_space<vmem>>, vector<1x8x32xf32>
    %21 = vector.shape_cast %20 : vector<1x8x32xf32> to vector<8x32xf32>
    %22 = vector.shape_cast %19 : vector<8x32xf32> to vector<1x8x32xf32>
    tpu.vector_store %arg11[%c1, %c0_17, %c0_18], %22 {strides = array<i32>} : memref<6x8x32xf32, #tpu.memory_space<vmem>>, vector<1x8x32xf32>,
    %23 = vector.extract_strided_slice %14 {offsets = [0, 64], sizes = [8, 32], strides = [1, 1]} : vector<8x192xf32> to vector<8x32xf32>
    %c2 = arith.constant 2 : index
    %c0_19 = arith.constant 0 : index
    %c0_20 = arith.constant 0 : index
    %24 = vector.load %arg11[%c2, %c0_19, %c0_20] : memref<6x8x32xf32, #tpu.memory_space<vmem>>, vector<1x8x32xf32>
    %25 = vector.shape_cast %24 : vector<1x8x32xf32> to vector<8x32xf32>
    %26 = vector.shape_cast %23 : vector<8x32xf32> to vector<1x8x32xf32>
    tpu.vector_store %arg11[%c2, %c0_19, %c0_20], %26 {strides = array<i32>} : memref<6x8x32xf32, #tpu.memory_space<vmem>>, vector<1x8x32xf32>,
    %27 = vector.extract_strided_slice %14 {offsets = [0, 96], sizes = [8, 32], strides = [1, 1]} : vector<8x192xf32> to vector<8x32xf32>
    %c3 = arith.constant 3 : index
    %c0_21 = arith.constant 0 : index
    %c0_22 = arith.constant 0 : index
    %28 = vector.load %arg11[%c3, %c0_21, %c0_22] : memref<6x8x32xf32, #tpu.memory_space<vmem>>, vector<1x8x32xf32>
    %29 = vector.shape_cast %28 : vector<1x8x32xf32> to vector<8x32xf32>
    %30 = vector.shape_cast %27 : vector<8x32xf32> to vector<1x8x32xf32>
    tpu.vector_store %arg11[%c3, %c0_21, %c0_22], %30 {strides = array<i32>} : memref<6x8x32xf32, #tpu.memory_space<vmem>>, vector<1x8x32xf32>,
    %31 = vector.extract_strided_slice %14 {offsets = [0, 128], sizes = [8, 32], strides = [1, 1]} : vector<8x192xf32> to vector<8x32xf32>
    %c4 = arith.constant 4 : index
    %c0_23 = arith.constant 0 : index
    %c0_24 = arith.constant 0 : index
    %32 = vector.load %arg11[%c4, %c0_23, %c0_24] : memref<6x8x32xf32, #tpu.memory_space<vmem>>, vector<1x8x32xf32>
    %33 = vector.shape_cast %32 : vector<1x8x32xf32> to vector<8x32xf32>
    %34 = vector.shape_cast %31 : vector<8x32xf32> to vector<1x8x32xf32>
    tpu.vector_store %arg11[%c4, %c0_23, %c0_24], %34 {strides = array<i32>} : memref<6x8x32xf32, #tpu.memory_space<vmem>>, vector<1x8x32xf32>,
    %35 = vector.extract_strided_slice %14 {offsets = [0, 160], sizes = [8, 32], strides = [1, 1]} : vector<8x192xf32> to vector<8x32xf32>
    %c5 = arith.constant 5 : index
    %c0_25 = arith.constant 0 : index
    %c0_26 = arith.constant 0 : index
    %36 = vector.load %arg11[%c5, %c0_25, %c0_26] : memref<6x8x32xf32, #tpu.memory_space<vmem>>, vector<1x8x32xf32>
    %37 = vector.shape_cast %36 : vector<1x8x32xf32> to vector<8x32xf32>
    %38 = vector.shape_cast %35 : vector<8x32xf32> to vector<1x8x32xf32>
    tpu.vector_store %arg11[%c5, %c0_25, %c0_26], %38 {strides = array<i32>} : memref<6x8x32xf32, #tpu.memory_space<vmem>>, vector<1x8x32xf32>,
    %c0_27 = arith.constant 0 : index
    %c0_28 = arith.constant 0 : index
    %c0_29 = arith.constant 0 : index
    %39 = vector.load %arg6[%c0_27, %c0_28, %c0_29] : memref<6x32x32xf32, #tpu.memory_space<vmem>>, vector<1x32x32xf32>
    %40 = vector.shape_cast %39 : vector<1x32x32xf32> to vector<32x32xf32>
    %c1_30 = arith.constant 1 : index
    %c0_31 = arith.constant 0 : index
    %c0_32 = arith.constant 0 : index
    %41 = vector.load %arg6[%c1_30, %c0_31, %c0_32] : memref<6x32x32xf32, #tpu.memory_space<vmem>>, vector<1x32x32xf32>
    %42 = vector.shape_cast %41 : vector<1x32x32xf32> to vector<32x32xf32>
    %c2_33 = arith.constant 2 : index
    %c0_34 = arith.constant 0 : index
    %c0_35 = arith.constant 0 : index
    %43 = vector.load %arg6[%c2_33, %c0_34, %c0_35] : memref<6x32x32xf32, #tpu.memory_space<vmem>>, vector<1x32x32xf32>
    %44 = vector.shape_cast %43 : vector<1x32x32xf32> to vector<32x32xf32>
    %c3_36 = arith.constant 3 : index
    %c0_37 = arith.constant 0 : index
    %c0_38 = arith.constant 0 : index
    %45 = vector.load %arg6[%c3_36, %c0_37, %c0_38] : memref<6x32x32xf32, #tpu.memory_space<vmem>>, vector<1x32x32xf32>
    %46 = vector.shape_cast %45 : vector<1x32x32xf32> to vector<32x32xf32>
    %c4_39 = arith.constant 4 : index
    %c0_40 = arith.constant 0 : index
    %c0_41 = arith.constant 0 : index
    %47 = vector.load %arg6[%c4_39, %c0_40, %c0_41] : memref<6x32x32xf32, #tpu.memory_space<vmem>>, vector<1x32x32xf32>
    %48 = vector.shape_cast %47 : vector<1x32x32xf32> to vector<32x32xf32>
    %c5_42 = arith.constant 5 : index
    %c0_43 = arith.constant 0 : index
    %c0_44 = arith.constant 0 : index
    %49 = vector.load %arg6[%c5_42, %c0_43, %c0_44] : memref<6x32x32xf32, #tpu.memory_space<vmem>>, vector<1x32x32xf32>
    %50 = vector.shape_cast %49 : vector<1x32x32xf32> to vector<32x32xf32>
    %c0_45 = arith.constant 0 : index
    %c0_46 = arith.constant 0 : index
    %c0_47 = arith.constant 0 : index
    %51 = vector.load %arg7[%c0_45, %c0_46, %c0_47] : memref<6x1x32xf32, #tpu.memory_space<vmem>>, vector<1x1x32xf32>
    %52 = vector.shape_cast %51 : vector<1x1x32xf32> to vector<1x32xf32>
    %c1_48 = arith.constant 1 : index
    %c0_49 = arith.constant 0 : index
    %c0_50 = arith.constant 0 : index
    %53 = vector.load %arg7[%c1_48, %c0_49, %c0_50] : memref<6x1x32xf32, #tpu.memory_space<vmem>>, vector<1x1x32xf32>
    %54 = vector.shape_cast %53 : vector<1x1x32xf32> to vector<1x32xf32>
    %c2_51 = arith.constant 2 : index
    %c0_52 = arith.constant 0 : index
    %c0_53 = arith.constant 0 : index
    %55 = vector.load %arg7[%c2_51, %c0_52, %c0_53] : memref<6x1x32xf32, #tpu.memory_space<vmem>>, vector<1x1x32xf32>
    %56 = vector.shape_cast %55 : vector<1x1x32xf32> to vector<1x32xf32>
    %c3_54 = arith.constant 3 : index
    %c0_55 = arith.constant 0 : index
    %c0_56 = arith.constant 0 : index
    %57 = vector.load %arg7[%c3_54, %c0_55, %c0_56] : memref<6x1x32xf32, #tpu.memory_space<vmem>>, vector<1x1x32xf32>
    %58 = vector.shape_cast %57 : vector<1x1x32xf32> to vector<1x32xf32>
    %c4_57 = arith.constant 4 : index
    %c0_58 = arith.constant 0 : index
    %c0_59 = arith.constant 0 : index
    %59 = vector.load %arg7[%c4_57, %c0_58, %c0_59] : memref<6x1x32xf32, #tpu.memory_space<vmem>>, vector<1x1x32xf32>
    %60 = vector.shape_cast %59 : vector<1x1x32xf32> to vector<1x32xf32>
    %c5_60 = arith.constant 5 : index
    %c0_61 = arith.constant 0 : index
    %c0_62 = arith.constant 0 : index
    %61 = vector.load %arg7[%c5_60, %c0_61, %c0_62] : memref<6x1x32xf32, #tpu.memory_space<vmem>>, vector<1x1x32xf32>
    %62 = vector.shape_cast %61 : vector<1x1x32xf32> to vector<1x32xf32>
    %cst_63 = arith.constant 0.000000e+00 : f32
    %63 = vector.broadcast %cst_63 : f32 to vector<2x2x32xf32>
    %c0_64 = arith.constant 0 : index
    %c0_65 = arith.constant 0 : index
    %c0_66 = arith.constant 0 : index
    %64 = vector.load %arg13[%c0_64, %c0_65, %c0_66] : memref<2x2x32xf32, #tpu.memory_space<vmem>>, vector<2x2x32xf32>
    tpu.vector_store %arg13[%c0_64, %c0_65, %c0_66], %63 {strides = array<i32>} : memref<2x2x32xf32, #tpu.memory_space<vmem>>, vector<2x2x32xf32>,
    %c0_i32 = arith.constant 0 : i32
    %c2_i32 = arith.constant 2 : i32
    %65 = arith.muli %c0_i32, %c2_i32 : i32
    %66 = tpu.assume_multiple %65, 2 : i32
    %c3_i32 = arith.constant 3 : i32
    %67 = arith.subi %c3_i32, %c0_i32 : i32
    %c2_i32_67 = arith.constant 2 : i32
    %68 = arith.muli %67, %c2_i32_67 : i32
    %69 = tpu.assume_multiple %68, 2 : i32
    %c0_68 = arith.constant 0 : index
    %c0_69 = arith.constant 0 : index
    %c0_70 = arith.constant 0 : index
    %70 = vector.load %arg13[%c0_68, %c0_69, %c0_70] : memref<2x2x32xf32, #tpu.memory_space<vmem>>, vector<1x2x32xf32>
    %71 = vector.shape_cast %70 : vector<1x2x32xf32> to vector<2x32xf32>
    %c0_71 = arith.constant 0 : index
    %72 = arith.index_cast %66 : i32 to index
    %c0_72 = arith.constant 0 : index
    %73 = vector.load %arg11[%c0_71, %72, %c0_72] : memref<6x8x32xf32, #tpu.memory_space<vmem>>, vector<1x2x32xf32>
    %74 = vector.shape_cast %73 : vector<1x2x32xf32> to vector<2x32xf32>
    %c1_73 = arith.constant 1 : index
    %75 = arith.index_cast %66 : i32 to index
    %c0_74 = arith.constant 0 : index
    %76 = vector.load %arg11[%c1_73, %75, %c0_74] : memref<6x8x32xf32, #tpu.memory_space<vmem>>, vector<1x2x32xf32>
    %77 = vector.shape_cast %76 : vector<1x2x32xf32> to vector<2x32xf32>
    %c2_75 = arith.constant 2 : index
    %78 = arith.index_cast %66 : i32 to index
    %c0_76 = arith.constant 0 : index
    %79 = vector.load %arg11[%c2_75, %78, %c0_76] : memref<6x8x32xf32, #tpu.memory_space<vmem>>, vector<1x2x32xf32>
    %80 = vector.shape_cast %79 : vector<1x2x32xf32> to vector<2x32xf32>
    %cst_77 = arith.constant dense<0.000000e+00> : vector<2x32xf32>
    %81 = tpu.matmul %71, %40, %cst_77 {dimension_numbers = #tpu.dot_dimension_numbers<[1], [0], [0], [1], [0, 0, 1, 1], [], []>} : vector<2x32xf32>, vector<32x32xf32>, vector<2x32xf32> -> vector<2x32xf32>
    %82 = vector.broadcast %52 : vector<1x32xf32> to vector<2x32xf32>
    %83 = arith.addf %81, %82 : vector<2x32xf32>
    %cst_78 = arith.constant dense<0.000000e+00> : vector<2x32xf32>
    %84 = tpu.matmul %71, %42, %cst_78 {dimension_numbers = #tpu.dot_dimension_numbers<[1], [0], [0], [1], [0, 0, 1, 1], [], []>} : vector<2x32xf32>, vector<32x32xf32>, vector<2x32xf32> -> vector<2x32xf32>
    %85 = vector.broadcast %54 : vector<1x32xf32> to vector<2x32xf32>
    %86 = arith.addf %84, %85 : vector<2x32xf32>
    %cst_79 = arith.constant dense<0.000000e+00> : vector<2x32xf32>
    %87 = tpu.matmul %71, %44, %cst_79 {dimension_numbers = #tpu.dot_dimension_numbers<[1], [0], [0], [1], [0, 0, 1, 1], [], []>} : vector<2x32xf32>, vector<32x32xf32>, vector<2x32xf32> -> vector<2x32xf32>
    %88 = vector.broadcast %56 : vector<1x32xf32> to vector<2x32xf32>
    %89 = arith.addf %87, %88 : vector<2x32xf32>
    %90 = arith.addf %74, %83 : vector<2x32xf32>
    %91 = arith.negf %90 : vector<2x32xf32>
    %92 = math.exp %91 : vector<2x32xf32>
    %cst_80 = arith.constant 1.000000e+00 : f32
    %93 = vector.broadcast %cst_80 : f32 to vector<2x32xf32>
    %94 = arith.addf %93, %92 : vector<2x32xf32>
    %95 = arith.divf %93, %94 : vector<2x32xf32>
    %96 = arith.addf %77, %86 : vector<2x32xf32>
    %97 = arith.negf %96 : vector<2x32xf32>
    %98 = math.exp %97 : vector<2x32xf32>
    %cst_81 = arith.constant 1.000000e+00 : f32
    %99 = vector.broadcast %cst_81 : f32 to vector<2x32xf32>
    %100 = arith.addf %99, %98 : vector<2x32xf32>
    %101 = arith.divf %99, %100 : vector<2x32xf32>
    %102 = arith.mulf %95, %89 : vector<2x32xf32>
    %103 = arith.addf %80, %102 : vector<2x32xf32>
    %104 = math.tanh %103 : vector<2x32xf32>
    %cst_82 = arith.constant 1.000000e+00 : f32
    %105 = vector.broadcast %cst_82 : f32 to vector<2x32xf32>
    %106 = arith.subf %105, %101 : vector<2x32xf32>
    %107 = arith.mulf %106, %104 : vector<2x32xf32>
    %108 = arith.mulf %101, %71 : vector<2x32xf32>
    %109 = arith.addf %107, %108 : vector<2x32xf32>
    %c0_83 = arith.constant 0 : index
    %c0_84 = arith.constant 0 : index
    %c0_85 = arith.constant 0 : index
    %110 = vector.load %arg13[%c0_83, %c0_84, %c0_85] : memref<2x2x32xf32, #tpu.memory_space<vmem>>, vector<1x2x32xf32>
    %111 = vector.shape_cast %110 : vector<1x2x32xf32> to vector<2x32xf32>
    %112 = vector.shape_cast %109 : vector<2x32xf32> to vector<1x2x32xf32>
    tpu.vector_store %arg13[%c0_83, %c0_84, %c0_85], %112 {strides = array<i32>} : memref<2x2x32xf32, #tpu.memory_space<vmem>>, vector<1x2x32xf32>,
    %c0_86 = arith.constant 0 : index
    %113 = arith.index_cast %66 : i32 to index
    %c0_87 = arith.constant 0 : index
    %114 = vector.load %arg12[%c0_86, %113, %c0_87] : memref<2x8x32xf32, #tpu.memory_space<vmem>>, vector<1x2x32xf32>
    %115 = vector.shape_cast %114 : vector<1x2x32xf32> to vector<2x32xf32>
    %116 = vector.shape_cast %109 : vector<2x32xf32> to vector<1x2x32xf32>
    tpu.vector_store %arg12[%c0_86, %113, %c0_87], %116 {strides = array<i32>} : memref<2x8x32xf32, #tpu.memory_space<vmem>>, vector<1x2x32xf32>,
    %c1_88 = arith.constant 1 : index
    %c0_89 = arith.constant 0 : index
    %c0_90 = arith.constant 0 : index
    %117 = vector.load %arg13[%c1_88, %c0_89, %c0_90] : memref<2x2x32xf32, #tpu.memory_space<vmem>>, vector<1x2x32xf32>
    %118 = vector.shape_cast %117 : vector<1x2x32xf32> to vector<2x32xf32>
    %c3_91 = arith.constant 3 : index
    %119 = arith.index_cast %69 : i32 to index
    %c0_92 = arith.constant 0 : index
    %120 = vector.load %arg11[%c3_91, %119, %c0_92] : memref<6x8x32xf32, #tpu.memory_space<vmem>>, vector<1x2x32xf32>
    %121 = vector.shape_cast %120 : vector<1x2x32xf32> to vector<2x32xf32>
    %c4_93 = arith.constant 4 : index
    %122 = arith.index_cast %69 : i32 to index
    %c0_94 = arith.constant 0 : index
    %123 = vector.load %arg11[%c4_93, %122, %c0_94] : memref<6x8x32xf32, #tpu.memory_space<vmem>>, vector<1x2x32xf32>
    %124 = vector.shape_cast %123 : vector<1x2x32xf32> to vector<2x32xf32>
    %c5_95 = arith.constant 5 : index
    %125 = arith.index_cast %69 : i32 to index
    %c0_96 = arith.constant 0 : index
    %126 = vector.load %arg11[%c5_95, %125, %c0_96] : memref<6x8x32xf32, #tpu.memory_space<vmem>>, vector<1x2x32xf32>
    %127 = vector.shape_cast %126 : vector<1x2x32xf32> to vector<2x32xf32>
    %cst_97 = arith.constant dense<0.000000e+00> : vector<2x32xf32>
    %128 = tpu.matmul %118, %46, %cst_97 {dimension_numbers = #tpu.dot_dimension_numbers<[1], [0], [0], [1], [0, 0, 1, 1], [], []>} : vector<2x32xf32>, vector<32x32xf32>, vector<2x32xf32> -> vector<2x32xf32>
    %129 = vector.broadcast %58 : vector<1x32xf32> to vector<2x32xf32>
    %130 = arith.addf %128, %129 : vector<2x32xf32>
    %cst_98 = arith.constant dense<0.000000e+00> : vector<2x32xf32>
    %131 = tpu.matmul %118, %48, %cst_98 {dimension_numbers = #tpu.dot_dimension_numbers<[1], [0], [0], [1], [0, 0, 1, 1], [], []>} : vector<2x32xf32>, vector<32x32xf32>, vector<2x32xf32> -> vector<2x32xf32>
    %132 = vector.broadcast %60 : vector<1x32xf32> to vector<2x32xf32>
    %133 = arith.addf %131, %132 : vector<2x32xf32>
    %cst_99 = arith.constant dense<0.000000e+00> : vector<2x32xf32>
    %134 = tpu.matmul %118, %50, %cst_99 {dimension_numbers = #tpu.dot_dimension_numbers<[1], [0], [0], [1], [0, 0, 1, 1], [], []>} : vector<2x32xf32>, vector<32x32xf32>, vector<2x32xf32> -> vector<2x32xf32>
    %135 = vector.broadcast %62 : vector<1x32xf32> to vector<2x32xf32>
    %136 = arith.addf %134, %135 : vector<2x32xf32>
    %137 = arith.addf %121, %130 : vector<2x32xf32>
    %138 = arith.negf %137 : vector<2x32xf32>
    %139 = math.exp %138 : vector<2x32xf32>
    %cst_100 = arith.constant 1.000000e+00 : f32
    %140 = vector.broadcast %cst_100 : f32 to vector<2x32xf32>
    %141 = arith.addf %140, %139 : vector<2x32xf32>
    %142 = arith.divf %140, %141 : vector<2x32xf32>
    %143 = arith.addf %124, %133 : vector<2x32xf32>
    %144 = arith.negf %143 : vector<2x32xf32>
    %145 = math.exp %144 : vector<2x32xf32>
    %cst_101 = arith.constant 1.000000e+00 : f32
    %146 = vector.broadcast %cst_101 : f32 to vector<2x32xf32>
    %147 = arith.addf %146, %145 : vector<2x32xf32>
    %148 = arith.divf %146, %147 : vector<2x32xf32>
    %149 = arith.mulf %142, %136 : vector<2x32xf32>
    %150 = arith.addf %127, %149 : vector<2x32xf32>
    %151 = math.tanh %150 : vector<2x32xf32>
    %cst_102 = arith.constant 1.000000e+00 : f32
    %152 = vector.broadcast %cst_102 : f32 to vector<2x32xf32>
    %153 = arith.subf %152, %148 : vector<2x32xf32>
    %154 = arith.mulf %153, %151 : vector<2x32xf32>
    %155 = arith.mulf %148, %118 : vector<2x32xf32>
    %156 = arith.addf %154, %155 : vector<2x32xf32>
    %c1_103 = arith.constant 1 : index
    %c0_104 = arith.constant 0 : index
    %c0_105 = arith.constant 0 : index
    %157 = vector.load %arg13[%c1_103, %c0_104, %c0_105] : memref<2x2x32xf32, #tpu.memory_space<vmem>>, vector<1x2x32xf32>
    %158 = vector.shape_cast %157 : vector<1x2x32xf32> to vector<2x32xf32>
    %159 = vector.shape_cast %156 : vector<2x32xf32> to vector<1x2x32xf32>
    tpu.vector_store %arg13[%c1_103, %c0_104, %c0_105], %159 {strides = array<i32>} : memref<2x2x32xf32, #tpu.memory_space<vmem>>, vector<1x2x32xf32>,
    %c1_106 = arith.constant 1 : index
    %160 = arith.index_cast %69 : i32 to index
    %c0_107 = arith.constant 0 : index
    %161 = vector.load %arg12[%c1_106, %160, %c0_107] : memref<2x8x32xf32, #tpu.memory_space<vmem>>, vector<1x2x32xf32>
    %162 = vector.shape_cast %161 : vector<1x2x32xf32> to vector<2x32xf32>
    %163 = vector.shape_cast %156 : vector<2x32xf32> to vector<1x2x32xf32>
    tpu.vector_store %arg12[%c1_106, %160, %c0_107], %163 {strides = array<i32>} : memref<2x8x32xf32, #tpu.memory_space<vmem>>, vector<1x2x32xf32>,
    %c1_i32 = arith.constant 1 : i32
    %c2_i32_108 = arith.constant 2 : i32
    %164 = arith.muli %c1_i32, %c2_i32_108 : i32
    %165 = tpu.assume_multiple %164, 2 : i32
    %c3_i32_109 = arith.constant 3 : i32
    %166 = arith.subi %c3_i32_109, %c1_i32 : i32
    %c2_i32_110 = arith.constant 2 : i32
    %167 = arith.muli %166, %c2_i32_110 : i32
    %168 = tpu.assume_multiple %167, 2 : i32
    %c0_111 = arith.constant 0 : index
    %c0_112 = arith.constant 0 : index
    %c0_113 = arith.constant 0 : index
    %169 = vector.load %arg13[%c0_111, %c0_112, %c0_113] : memref<2x2x32xf32, #tpu.memory_space<vmem>>, vector<1x2x32xf32>
    %170 = vector.shape_cast %169 : vector<1x2x32xf32> to vector<2x32xf32>
    %c0_114 = arith.constant 0 : index
    %171 = arith.index_cast %165 : i32 to index
    %c0_115 = arith.constant 0 : index
    %172 = vector.load %arg11[%c0_114, %171, %c0_115] : memref<6x8x32xf32, #tpu.memory_space<vmem>>, vector<1x2x32xf32>
    %173 = vector.shape_cast %172 : vector<1x2x32xf32> to vector<2x32xf32>
    %c1_116 = arith.constant 1 : index
    %174 = arith.index_cast %165 : i32 to index
    %c0_117 = arith.constant 0 : index
    %175 = vector.load %arg11[%c1_116, %174, %c0_117] : memref<6x8x32xf32, #tpu.memory_space<vmem>>, vector<1x2x32xf32>
    %176 = vector.shape_cast %175 : vector<1x2x32xf32> to vector<2x32xf32>
    %c2_118 = arith.constant 2 : index
    %177 = arith.index_cast %165 : i32 to index
    %c0_119 = arith.constant 0 : index
    %178 = vector.load %arg11[%c2_118, %177, %c0_119] : memref<6x8x32xf32, #tpu.memory_space<vmem>>, vector<1x2x32xf32>
    %179 = vector.shape_cast %178 : vector<1x2x32xf32> to vector<2x32xf32>
    %cst_120 = arith.constant dense<0.000000e+00> : vector<2x32xf32>
    %180 = tpu.matmul %170, %40, %cst_120 {dimension_numbers = #tpu.dot_dimension_numbers<[1], [0], [0], [1], [0, 0, 1, 1], [], []>} : vector<2x32xf32>, vector<32x32xf32>, vector<2x32xf32> -> vector<2x32xf32>
    %181 = vector.broadcast %52 : vector<1x32xf32> to vector<2x32xf32>
    %182 = arith.addf %180, %181 : vector<2x32xf32>
    %cst_121 = arith.constant dense<0.000000e+00> : vector<2x32xf32>
    %183 = tpu.matmul %170, %42, %cst_121 {dimension_numbers = #tpu.dot_dimension_numbers<[1], [0], [0], [1], [0, 0, 1, 1], [], []>} : vector<2x32xf32>, vector<32x32xf32>, vector<2x32xf32> -> vector<2x32xf32>
    %184 = vector.broadcast %54 : vector<1x32xf32> to vector<2x32xf32>
    %185 = arith.addf %183, %184 : vector<2x32xf32>
    %cst_122 = arith.constant dense<0.000000e+00> : vector<2x32xf32>
    %186 = tpu.matmul %170, %44, %cst_122 {dimension_numbers = #tpu.dot_dimension_numbers<[1], [0], [0], [1], [0, 0, 1, 1], [], []>} : vector<2x32xf32>, vector<32x32xf32>, vector<2x32xf32> -> vector<2x32xf32>
    %187 = vector.broadcast %56 : vector<1x32xf32> to vector<2x32xf32>
    %188 = arith.addf %186, %187 : vector<2x32xf32>
    %189 = arith.addf %173, %182 : vector<2x32xf32>
    %190 = arith.negf %189 : vector<2x32xf32>
    %191 = math.exp %190 : vector<2x32xf32>
    %cst_123 = arith.constant 1.000000e+00 : f32
    %192 = vector.broadcast %cst_123 : f32 to vector<2x32xf32>
    %193 = arith.addf %192, %191 : vector<2x32xf32>
    %194 = arith.divf %192, %193 : vector<2x32xf32>
    %195 = arith.addf %176, %185 : vector<2x32xf32>
    %196 = arith.negf %195 : vector<2x32xf32>
    %197 = math.exp %196 : vector<2x32xf32>
    %cst_124 = arith.constant 1.000000e+00 : f32
    %198 = vector.broadcast %cst_124 : f32 to vector<2x32xf32>
    %199 = arith.addf %198, %197 : vector<2x32xf32>
    %200 = arith.divf %198, %199 : vector<2x32xf32>
    %201 = arith.mulf %194, %188 : vector<2x32xf32>
    %202 = arith.addf %179, %201 : vector<2x32xf32>
    %203 = math.tanh %202 : vector<2x32xf32>
    %cst_125 = arith.constant 1.000000e+00 : f32
    %204 = vector.broadcast %cst_125 : f32 to vector<2x32xf32>
    %205 = arith.subf %204, %200 : vector<2x32xf32>
    %206 = arith.mulf %205, %203 : vector<2x32xf32>
    %207 = arith.mulf %200, %170 : vector<2x32xf32>
    %208 = arith.addf %206, %207 : vector<2x32xf32>
    %c0_126 = arith.constant 0 : index
    %c0_127 = arith.constant 0 : index
    %c0_128 = arith.constant 0 : index
    %209 = vector.load %arg13[%c0_126, %c0_127, %c0_128] : memref<2x2x32xf32, #tpu.memory_space<vmem>>, vector<1x2x32xf32>
    %210 = vector.shape_cast %209 : vector<1x2x32xf32> to vector<2x32xf32>
    %211 = vector.shape_cast %208 : vector<2x32xf32> to vector<1x2x32xf32>
    tpu.vector_store %arg13[%c0_126, %c0_127, %c0_128], %211 {strides = array<i32>} : memref<2x2x32xf32, #tpu.memory_space<vmem>>, vector<1x2x32xf32>,
    %c0_129 = arith.constant 0 : index
    %212 = arith.index_cast %165 : i32 to index
    %c0_130 = arith.constant 0 : index
    %213 = vector.load %arg12[%c0_129, %212, %c0_130] : memref<2x8x32xf32, #tpu.memory_space<vmem>>, vector<1x2x32xf32>
    %214 = vector.shape_cast %213 : vector<1x2x32xf32> to vector<2x32xf32>
    %215 = vector.shape_cast %208 : vector<2x32xf32> to vector<1x2x32xf32>
    tpu.vector_store %arg12[%c0_129, %212, %c0_130], %215 {strides = array<i32>} : memref<2x8x32xf32, #tpu.memory_space<vmem>>, vector<1x2x32xf32>,
    %c1_131 = arith.constant 1 : index
    %c0_132 = arith.constant 0 : index
    %c0_133 = arith.constant 0 : index
    %216 = vector.load %arg13[%c1_131, %c0_132, %c0_133] : memref<2x2x32xf32, #tpu.memory_space<vmem>>, vector<1x2x32xf32>
    %217 = vector.shape_cast %216 : vector<1x2x32xf32> to vector<2x32xf32>
    %c3_134 = arith.constant 3 : index
    %218 = arith.index_cast %168 : i32 to index
    %c0_135 = arith.constant 0 : index
    %219 = vector.load %arg11[%c3_134, %218, %c0_135] : memref<6x8x32xf32, #tpu.memory_space<vmem>>, vector<1x2x32xf32>
    %220 = vector.shape_cast %219 : vector<1x2x32xf32> to vector<2x32xf32>
    %c4_136 = arith.constant 4 : index
    %221 = arith.index_cast %168 : i32 to index
    %c0_137 = arith.constant 0 : index
    %222 = vector.load %arg11[%c4_136, %221, %c0_137] : memref<6x8x32xf32, #tpu.memory_space<vmem>>, vector<1x2x32xf32>
    %223 = vector.shape_cast %222 : vector<1x2x32xf32> to vector<2x32xf32>
    %c5_138 = arith.constant 5 : index
    %224 = arith.index_cast %168 : i32 to index
    %c0_139 = arith.constant 0 : index
    %225 = vector.load %arg11[%c5_138, %224, %c0_139] : memref<6x8x32xf32, #tpu.memory_space<vmem>>, vector<1x2x32xf32>
    %226 = vector.shape_cast %225 : vector<1x2x32xf32> to vector<2x32xf32>
    %cst_140 = arith.constant dense<0.000000e+00> : vector<2x32xf32>
    %227 = tpu.matmul %217, %46, %cst_140 {dimension_numbers = #tpu.dot_dimension_numbers<[1], [0], [0], [1], [0, 0, 1, 1], [], []>} : vector<2x32xf32>, vector<32x32xf32>, vector<2x32xf32> -> vector<2x32xf32>
    %228 = vector.broadcast %58 : vector<1x32xf32> to vector<2x32xf32>
    %229 = arith.addf %227, %228 : vector<2x32xf32>
    %cst_141 = arith.constant dense<0.000000e+00> : vector<2x32xf32>
    %230 = tpu.matmul %217, %48, %cst_141 {dimension_numbers = #tpu.dot_dimension_numbers<[1], [0], [0], [1], [0, 0, 1, 1], [], []>} : vector<2x32xf32>, vector<32x32xf32>, vector<2x32xf32> -> vector<2x32xf32>
    %231 = vector.broadcast %60 : vector<1x32xf32> to vector<2x32xf32>
    %232 = arith.addf %230, %231 : vector<2x32xf32>
    %cst_142 = arith.constant dense<0.000000e+00> : vector<2x32xf32>
    %233 = tpu.matmul %217, %50, %cst_142 {dimension_numbers = #tpu.dot_dimension_numbers<[1], [0], [0], [1], [0, 0, 1, 1], [], []>} : vector<2x32xf32>, vector<32x32xf32>, vector<2x32xf32> -> vector<2x32xf32>
    %234 = vector.broadcast %62 : vector<1x32xf32> to vector<2x32xf32>
    %235 = arith.addf %233, %234 : vector<2x32xf32>
    %236 = arith.addf %220, %229 : vector<2x32xf32>
    %237 = arith.negf %236 : vector<2x32xf32>
    %238 = math.exp %237 : vector<2x32xf32>
    %cst_143 = arith.constant 1.000000e+00 : f32
    %239 = vector.broadcast %cst_143 : f32 to vector<2x32xf32>
    %240 = arith.addf %239, %238 : vector<2x32xf32>
    %241 = arith.divf %239, %240 : vector<2x32xf32>
    %242 = arith.addf %223, %232 : vector<2x32xf32>
    %243 = arith.negf %242 : vector<2x32xf32>
    %244 = math.exp %243 : vector<2x32xf32>
    %cst_144 = arith.constant 1.000000e+00 : f32
    %245 = vector.broadcast %cst_144 : f32 to vector<2x32xf32>
    %246 = arith.addf %245, %244 : vector<2x32xf32>
    %247 = arith.divf %245, %246 : vector<2x32xf32>
    %248 = arith.mulf %241, %235 : vector<2x32xf32>
    %249 = arith.addf %226, %248 : vector<2x32xf32>
    %250 = math.tanh %249 : vector<2x32xf32>
    %cst_145 = arith.constant 1.000000e+00 : f32
    %251 = vector.broadcast %cst_145 : f32 to vector<2x32xf32>
    %252 = arith.subf %251, %247 : vector<2x32xf32>
    %253 = arith.mulf %252, %250 : vector<2x32xf32>
    %254 = arith.mulf %247, %217 : vector<2x32xf32>
    %255 = arith.addf %253, %254 : vector<2x32xf32>
    %c1_146 = arith.constant 1 : index
    %c0_147 = arith.constant 0 : index
    %c0_148 = arith.constant 0 : index
    %256 = vector.load %arg13[%c1_146, %c0_147, %c0_148] : memref<2x2x32xf32, #tpu.memory_space<vmem>>, vector<1x2x32xf32>
    %257 = vector.shape_cast %256 : vector<1x2x32xf32> to vector<2x32xf32>
    %258 = vector.shape_cast %255 : vector<2x32xf32> to vector<1x2x32xf32>
    tpu.vector_store %arg13[%c1_146, %c0_147, %c0_148], %258 {strides = array<i32>} : memref<2x2x32xf32, #tpu.memory_space<vmem>>, vector<1x2x32xf32>,
    %c1_149 = arith.constant 1 : index
    %259 = arith.index_cast %168 : i32 to index
    %c0_150 = arith.constant 0 : index
    %260 = vector.load %arg12[%c1_149, %259, %c0_150] : memref<2x8x32xf32, #tpu.memory_space<vmem>>, vector<1x2x32xf32>
    %261 = vector.shape_cast %260 : vector<1x2x32xf32> to vector<2x32xf32>
    %262 = vector.shape_cast %255 : vector<2x32xf32> to vector<1x2x32xf32>
    tpu.vector_store %arg12[%c1_149, %259, %c0_150], %262 {strides = array<i32>} : memref<2x8x32xf32, #tpu.memory_space<vmem>>, vector<1x2x32xf32>,
    %c2_i32_151 = arith.constant 2 : i32
    %c2_i32_152 = arith.constant 2 : i32
    %263 = arith.muli %c2_i32_151, %c2_i32_152 : i32
    %264 = tpu.assume_multiple %263, 2 : i32
    %c3_i32_153 = arith.constant 3 : i32
    %265 = arith.subi %c3_i32_153, %c2_i32_151 : i32
    %c2_i32_154 = arith.constant 2 : i32
    %266 = arith.muli %265, %c2_i32_154 : i32
    %267 = tpu.assume_multiple %266, 2 : i32
    %c0_155 = arith.constant 0 : index
    %c0_156 = arith.constant 0 : index
    %c0_157 = arith.constant 0 : index
    %268 = vector.load %arg13[%c0_155, %c0_156, %c0_157] : memref<2x2x32xf32, #tpu.memory_space<vmem>>, vector<1x2x32xf32>
    %269 = vector.shape_cast %268 : vector<1x2x32xf32> to vector<2x32xf32>
    %c0_158 = arith.constant 0 : index
    %270 = arith.index_cast %264 : i32 to index
    %c0_159 = arith.constant 0 : index
    %271 = vector.load %arg11[%c0_158, %270, %c0_159] : memref<6x8x32xf32, #tpu.memory_space<vmem>>, vector<1x2x32xf32>
    %272 = vector.shape_cast %271 : vector<1x2x32xf32> to vector<2x32xf32>
    %c1_160 = arith.constant 1 : index
    %273 = arith.index_cast %264 : i32 to index
    %c0_161 = arith.constant 0 : index
    %274 = vector.load %arg11[%c1_160, %273, %c0_161] : memref<6x8x32xf32, #tpu.memory_space<vmem>>, vector<1x2x32xf32>
    %275 = vector.shape_cast %274 : vector<1x2x32xf32> to vector<2x32xf32>
    %c2_162 = arith.constant 2 : index
    %276 = arith.index_cast %264 : i32 to index
    %c0_163 = arith.constant 0 : index
    %277 = vector.load %arg11[%c2_162, %276, %c0_163] : memref<6x8x32xf32, #tpu.memory_space<vmem>>, vector<1x2x32xf32>
    %278 = vector.shape_cast %277 : vector<1x2x32xf32> to vector<2x32xf32>
    %cst_164 = arith.constant dense<0.000000e+00> : vector<2x32xf32>
    %279 = tpu.matmul %269, %40, %cst_164 {dimension_numbers = #tpu.dot_dimension_numbers<[1], [0], [0], [1], [0, 0, 1, 1], [], []>} : vector<2x32xf32>, vector<32x32xf32>, vector<2x32xf32> -> vector<2x32xf32>
    %280 = vector.broadcast %52 : vector<1x32xf32> to vector<2x32xf32>
    %281 = arith.addf %279, %280 : vector<2x32xf32>
    %cst_165 = arith.constant dense<0.000000e+00> : vector<2x32xf32>
    %282 = tpu.matmul %269, %42, %cst_165 {dimension_numbers = #tpu.dot_dimension_numbers<[1], [0], [0], [1], [0, 0, 1, 1], [], []>} : vector<2x32xf32>, vector<32x32xf32>, vector<2x32xf32> -> vector<2x32xf32>
    %283 = vector.broadcast %54 : vector<1x32xf32> to vector<2x32xf32>
    %284 = arith.addf %282, %283 : vector<2x32xf32>
    %cst_166 = arith.constant dense<0.000000e+00> : vector<2x32xf32>
    %285 = tpu.matmul %269, %44, %cst_166 {dimension_numbers = #tpu.dot_dimension_numbers<[1], [0], [0], [1], [0, 0, 1, 1], [], []>} : vector<2x32xf32>, vector<32x32xf32>, vector<2x32xf32> -> vector<2x32xf32>
    %286 = vector.broadcast %56 : vector<1x32xf32> to vector<2x32xf32>
    %287 = arith.addf %285, %286 : vector<2x32xf32>
    %288 = arith.addf %272, %281 : vector<2x32xf32>
    %289 = arith.negf %288 : vector<2x32xf32>
    %290 = math.exp %289 : vector<2x32xf32>
    %cst_167 = arith.constant 1.000000e+00 : f32
    %291 = vector.broadcast %cst_167 : f32 to vector<2x32xf32>
    %292 = arith.addf %291, %290 : vector<2x32xf32>
    %293 = arith.divf %291, %292 : vector<2x32xf32>
    %294 = arith.addf %275, %284 : vector<2x32xf32>
    %295 = arith.negf %294 : vector<2x32xf32>
    %296 = math.exp %295 : vector<2x32xf32>
    %cst_168 = arith.constant 1.000000e+00 : f32
    %297 = vector.broadcast %cst_168 : f32 to vector<2x32xf32>
    %298 = arith.addf %297, %296 : vector<2x32xf32>
    %299 = arith.divf %297, %298 : vector<2x32xf32>
    %300 = arith.mulf %293, %287 : vector<2x32xf32>
    %301 = arith.addf %278, %300 : vector<2x32xf32>
    %302 = math.tanh %301 : vector<2x32xf32>
    %cst_169 = arith.constant 1.000000e+00 : f32
    %303 = vector.broadcast %cst_169 : f32 to vector<2x32xf32>
    %304 = arith.subf %303, %299 : vector<2x32xf32>
    %305 = arith.mulf %304, %302 : vector<2x32xf32>
    %306 = arith.mulf %299, %269 : vector<2x32xf32>
    %307 = arith.addf %305, %306 : vector<2x32xf32>
    %c0_170 = arith.constant 0 : index
    %c0_171 = arith.constant 0 : index
    %c0_172 = arith.constant 0 : index
    %308 = vector.load %arg13[%c0_170, %c0_171, %c0_172] : memref<2x2x32xf32, #tpu.memory_space<vmem>>, vector<1x2x32xf32>
    %309 = vector.shape_cast %308 : vector<1x2x32xf32> to vector<2x32xf32>
    %310 = vector.shape_cast %307 : vector<2x32xf32> to vector<1x2x32xf32>
    tpu.vector_store %arg13[%c0_170, %c0_171, %c0_172], %310 {strides = array<i32>} : memref<2x2x32xf32, #tpu.memory_space<vmem>>, vector<1x2x32xf32>,
    %c0_173 = arith.constant 0 : index
    %311 = arith.index_cast %264 : i32 to index
    %c0_174 = arith.constant 0 : index
    %312 = vector.load %arg12[%c0_173, %311, %c0_174] : memref<2x8x32xf32, #tpu.memory_space<vmem>>, vector<1x2x32xf32>
    %313 = vector.shape_cast %312 : vector<1x2x32xf32> to vector<2x32xf32>
    %314 = vector.shape_cast %307 : vector<2x32xf32> to vector<1x2x32xf32>
    tpu.vector_store %arg12[%c0_173, %311, %c0_174], %314 {strides = array<i32>} : memref<2x8x32xf32, #tpu.memory_space<vmem>>, vector<1x2x32xf32>,
    %c1_175 = arith.constant 1 : index
    %c0_176 = arith.constant 0 : index
    %c0_177 = arith.constant 0 : index
    %315 = vector.load %arg13[%c1_175, %c0_176, %c0_177] : memref<2x2x32xf32, #tpu.memory_space<vmem>>, vector<1x2x32xf32>
    %316 = vector.shape_cast %315 : vector<1x2x32xf32> to vector<2x32xf32>
    %c3_178 = arith.constant 3 : index
    %317 = arith.index_cast %267 : i32 to index
    %c0_179 = arith.constant 0 : index
    %318 = vector.load %arg11[%c3_178, %317, %c0_179] : memref<6x8x32xf32, #tpu.memory_space<vmem>>, vector<1x2x32xf32>
    %319 = vector.shape_cast %318 : vector<1x2x32xf32> to vector<2x32xf32>
    %c4_180 = arith.constant 4 : index
    %320 = arith.index_cast %267 : i32 to index
    %c0_181 = arith.constant 0 : index
    %321 = vector.load %arg11[%c4_180, %320, %c0_181] : memref<6x8x32xf32, #tpu.memory_space<vmem>>, vector<1x2x32xf32>
    %322 = vector.shape_cast %321 : vector<1x2x32xf32> to vector<2x32xf32>
    %c5_182 = arith.constant 5 : index
    %323 = arith.index_cast %267 : i32 to index
    %c0_183 = arith.constant 0 : index
    %324 = vector.load %arg11[%c5_182, %323, %c0_183] : memref<6x8x32xf32, #tpu.memory_space<vmem>>, vector<1x2x32xf32>
    %325 = vector.shape_cast %324 : vector<1x2x32xf32> to vector<2x32xf32>
    %cst_184 = arith.constant dense<0.000000e+00> : vector<2x32xf32>
    %326 = tpu.matmul %316, %46, %cst_184 {dimension_numbers = #tpu.dot_dimension_numbers<[1], [0], [0], [1], [0, 0, 1, 1], [], []>} : vector<2x32xf32>, vector<32x32xf32>, vector<2x32xf32> -> vector<2x32xf32>
    %327 = vector.broadcast %58 : vector<1x32xf32> to vector<2x32xf32>
    %328 = arith.addf %326, %327 : vector<2x32xf32>
    %cst_185 = arith.constant dense<0.000000e+00> : vector<2x32xf32>
    %329 = tpu.matmul %316, %48, %cst_185 {dimension_numbers = #tpu.dot_dimension_numbers<[1], [0], [0], [1], [0, 0, 1, 1], [], []>} : vector<2x32xf32>, vector<32x32xf32>, vector<2x32xf32> -> vector<2x32xf32>
    %330 = vector.broadcast %60 : vector<1x32xf32> to vector<2x32xf32>
    %331 = arith.addf %329, %330 : vector<2x32xf32>
    %cst_186 = arith.constant dense<0.000000e+00> : vector<2x32xf32>
    %332 = tpu.matmul %316, %50, %cst_186 {dimension_numbers = #tpu.dot_dimension_numbers<[1], [0], [0], [1], [0, 0, 1, 1], [], []>} : vector<2x32xf32>, vector<32x32xf32>, vector<2x32xf32> -> vector<2x32xf32>
    %333 = vector.broadcast %62 : vector<1x32xf32> to vector<2x32xf32>
    %334 = arith.addf %332, %333 : vector<2x32xf32>
    %335 = arith.addf %319, %328 : vector<2x32xf32>
    %336 = arith.negf %335 : vector<2x32xf32>
    %337 = math.exp %336 : vector<2x32xf32>
    %cst_187 = arith.constant 1.000000e+00 : f32
    %338 = vector.broadcast %cst_187 : f32 to vector<2x32xf32>
    %339 = arith.addf %338, %337 : vector<2x32xf32>
    %340 = arith.divf %338, %339 : vector<2x32xf32>
    %341 = arith.addf %322, %331 : vector<2x32xf32>
    %342 = arith.negf %341 : vector<2x32xf32>
    %343 = math.exp %342 : vector<2x32xf32>
    %cst_188 = arith.constant 1.000000e+00 : f32
    %344 = vector.broadcast %cst_188 : f32 to vector<2x32xf32>
    %345 = arith.addf %344, %343 : vector<2x32xf32>
    %346 = arith.divf %344, %345 : vector<2x32xf32>
    %347 = arith.mulf %340, %334 : vector<2x32xf32>
    %348 = arith.addf %325, %347 : vector<2x32xf32>
    %349 = math.tanh %348 : vector<2x32xf32>
    %cst_189 = arith.constant 1.000000e+00 : f32
    %350 = vector.broadcast %cst_189 : f32 to vector<2x32xf32>
    %351 = arith.subf %350, %346 : vector<2x32xf32>
    %352 = arith.mulf %351, %349 : vector<2x32xf32>
    %353 = arith.mulf %346, %316 : vector<2x32xf32>
    %354 = arith.addf %352, %353 : vector<2x32xf32>
    %c1_190 = arith.constant 1 : index
    %c0_191 = arith.constant 0 : index
    %c0_192 = arith.constant 0 : index
    %355 = vector.load %arg13[%c1_190, %c0_191, %c0_192] : memref<2x2x32xf32, #tpu.memory_space<vmem>>, vector<1x2x32xf32>
    %356 = vector.shape_cast %355 : vector<1x2x32xf32> to vector<2x32xf32>
    %357 = vector.shape_cast %354 : vector<2x32xf32> to vector<1x2x32xf32>
    tpu.vector_store %arg13[%c1_190, %c0_191, %c0_192], %357 {strides = array<i32>} : memref<2x2x32xf32, #tpu.memory_space<vmem>>, vector<1x2x32xf32>,
    %c1_193 = arith.constant 1 : index
    %358 = arith.index_cast %267 : i32 to index
    %c0_194 = arith.constant 0 : index
    %359 = vector.load %arg12[%c1_193, %358, %c0_194] : memref<2x8x32xf32, #tpu.memory_space<vmem>>, vector<1x2x32xf32>
    %360 = vector.shape_cast %359 : vector<1x2x32xf32> to vector<2x32xf32>
    %361 = vector.shape_cast %354 : vector<2x32xf32> to vector<1x2x32xf32>
    tpu.vector_store %arg12[%c1_193, %358, %c0_194], %361 {strides = array<i32>} : memref<2x8x32xf32, #tpu.memory_space<vmem>>, vector<1x2x32xf32>,
    %c3_i32_195 = arith.constant 3 : i32
    %c2_i32_196 = arith.constant 2 : i32
    %362 = arith.muli %c3_i32_195, %c2_i32_196 : i32
    %363 = tpu.assume_multiple %362, 2 : i32
    %c3_i32_197 = arith.constant 3 : i32
    %364 = arith.subi %c3_i32_197, %c3_i32_195 : i32
    %c2_i32_198 = arith.constant 2 : i32
    %365 = arith.muli %364, %c2_i32_198 : i32
    %366 = tpu.assume_multiple %365, 2 : i32
    %c0_199 = arith.constant 0 : index
    %c0_200 = arith.constant 0 : index
    %c0_201 = arith.constant 0 : index
    %367 = vector.load %arg13[%c0_199, %c0_200, %c0_201] : memref<2x2x32xf32, #tpu.memory_space<vmem>>, vector<1x2x32xf32>
    %368 = vector.shape_cast %367 : vector<1x2x32xf32> to vector<2x32xf32>
    %c0_202 = arith.constant 0 : index
    %369 = arith.index_cast %363 : i32 to index
    %c0_203 = arith.constant 0 : index
    %370 = vector.load %arg11[%c0_202, %369, %c0_203] : memref<6x8x32xf32, #tpu.memory_space<vmem>>, vector<1x2x32xf32>
    %371 = vector.shape_cast %370 : vector<1x2x32xf32> to vector<2x32xf32>
    %c1_204 = arith.constant 1 : index
    %372 = arith.index_cast %363 : i32 to index
    %c0_205 = arith.constant 0 : index
    %373 = vector.load %arg11[%c1_204, %372, %c0_205] : memref<6x8x32xf32, #tpu.memory_space<vmem>>, vector<1x2x32xf32>
    %374 = vector.shape_cast %373 : vector<1x2x32xf32> to vector<2x32xf32>
    %c2_206 = arith.constant 2 : index
    %375 = arith.index_cast %363 : i32 to index
    %c0_207 = arith.constant 0 : index
    %376 = vector.load %arg11[%c2_206, %375, %c0_207] : memref<6x8x32xf32, #tpu.memory_space<vmem>>, vector<1x2x32xf32>
    %377 = vector.shape_cast %376 : vector<1x2x32xf32> to vector<2x32xf32>
    %cst_208 = arith.constant dense<0.000000e+00> : vector<2x32xf32>
    %378 = tpu.matmul %368, %40, %cst_208 {dimension_numbers = #tpu.dot_dimension_numbers<[1], [0], [0], [1], [0, 0, 1, 1], [], []>} : vector<2x32xf32>, vector<32x32xf32>, vector<2x32xf32> -> vector<2x32xf32>
    %379 = vector.broadcast %52 : vector<1x32xf32> to vector<2x32xf32>
    %380 = arith.addf %378, %379 : vector<2x32xf32>
    %cst_209 = arith.constant dense<0.000000e+00> : vector<2x32xf32>
    %381 = tpu.matmul %368, %42, %cst_209 {dimension_numbers = #tpu.dot_dimension_numbers<[1], [0], [0], [1], [0, 0, 1, 1], [], []>} : vector<2x32xf32>, vector<32x32xf32>, vector<2x32xf32> -> vector<2x32xf32>
    %382 = vector.broadcast %54 : vector<1x32xf32> to vector<2x32xf32>
    %383 = arith.addf %381, %382 : vector<2x32xf32>
    %cst_210 = arith.constant dense<0.000000e+00> : vector<2x32xf32>
    %384 = tpu.matmul %368, %44, %cst_210 {dimension_numbers = #tpu.dot_dimension_numbers<[1], [0], [0], [1], [0, 0, 1, 1], [], []>} : vector<2x32xf32>, vector<32x32xf32>, vector<2x32xf32> -> vector<2x32xf32>
    %385 = vector.broadcast %56 : vector<1x32xf32> to vector<2x32xf32>
    %386 = arith.addf %384, %385 : vector<2x32xf32>
    %387 = arith.addf %371, %380 : vector<2x32xf32>
    %388 = arith.negf %387 : vector<2x32xf32>
    %389 = math.exp %388 : vector<2x32xf32>
    %cst_211 = arith.constant 1.000000e+00 : f32
    %390 = vector.broadcast %cst_211 : f32 to vector<2x32xf32>
    %391 = arith.addf %390, %389 : vector<2x32xf32>
    %392 = arith.divf %390, %391 : vector<2x32xf32>
    %393 = arith.addf %374, %383 : vector<2x32xf32>
    %394 = arith.negf %393 : vector<2x32xf32>
    %395 = math.exp %394 : vector<2x32xf32>
    %cst_212 = arith.constant 1.000000e+00 : f32
    %396 = vector.broadcast %cst_212 : f32 to vector<2x32xf32>
    %397 = arith.addf %396, %395 : vector<2x32xf32>
    %398 = arith.divf %396, %397 : vector<2x32xf32>
    %399 = arith.mulf %392, %386 : vector<2x32xf32>
    %400 = arith.addf %377, %399 : vector<2x32xf32>
    %401 = math.tanh %400 : vector<2x32xf32>
    %cst_213 = arith.constant 1.000000e+00 : f32
    %402 = vector.broadcast %cst_213 : f32 to vector<2x32xf32>
    %403 = arith.subf %402, %398 : vector<2x32xf32>
    %404 = arith.mulf %403, %401 : vector<2x32xf32>
    %405 = arith.mulf %398, %368 : vector<2x32xf32>
    %406 = arith.addf %404, %405 : vector<2x32xf32>
    %c0_214 = arith.constant 0 : index
    %c0_215 = arith.constant 0 : index
    %c0_216 = arith.constant 0 : index
    %407 = vector.load %arg13[%c0_214, %c0_215, %c0_216] : memref<2x2x32xf32, #tpu.memory_space<vmem>>, vector<1x2x32xf32>
    %408 = vector.shape_cast %407 : vector<1x2x32xf32> to vector<2x32xf32>
    %409 = vector.shape_cast %406 : vector<2x32xf32> to vector<1x2x32xf32>
    tpu.vector_store %arg13[%c0_214, %c0_215, %c0_216], %409 {strides = array<i32>} : memref<2x2x32xf32, #tpu.memory_space<vmem>>, vector<1x2x32xf32>,
    %c0_217 = arith.constant 0 : index
    %410 = arith.index_cast %363 : i32 to index
    %c0_218 = arith.constant 0 : index
    %411 = vector.load %arg12[%c0_217, %410, %c0_218] : memref<2x8x32xf32, #tpu.memory_space<vmem>>, vector<1x2x32xf32>
    %412 = vector.shape_cast %411 : vector<1x2x32xf32> to vector<2x32xf32>
    %413 = vector.shape_cast %406 : vector<2x32xf32> to vector<1x2x32xf32>
    tpu.vector_store %arg12[%c0_217, %410, %c0_218], %413 {strides = array<i32>} : memref<2x8x32xf32, #tpu.memory_space<vmem>>, vector<1x2x32xf32>,
    %c1_219 = arith.constant 1 : index
    %c0_220 = arith.constant 0 : index
    %c0_221 = arith.constant 0 : index
    %414 = vector.load %arg13[%c1_219, %c0_220, %c0_221] : memref<2x2x32xf32, #tpu.memory_space<vmem>>, vector<1x2x32xf32>
    %415 = vector.shape_cast %414 : vector<1x2x32xf32> to vector<2x32xf32>
    %c3_222 = arith.constant 3 : index
    %416 = arith.index_cast %366 : i32 to index
    %c0_223 = arith.constant 0 : index
    %417 = vector.load %arg11[%c3_222, %416, %c0_223] : memref<6x8x32xf32, #tpu.memory_space<vmem>>, vector<1x2x32xf32>
    %418 = vector.shape_cast %417 : vector<1x2x32xf32> to vector<2x32xf32>
    %c4_224 = arith.constant 4 : index
    %419 = arith.index_cast %366 : i32 to index
    %c0_225 = arith.constant 0 : index
    %420 = vector.load %arg11[%c4_224, %419, %c0_225] : memref<6x8x32xf32, #tpu.memory_space<vmem>>, vector<1x2x32xf32>
    %421 = vector.shape_cast %420 : vector<1x2x32xf32> to vector<2x32xf32>
    %c5_226 = arith.constant 5 : index
    %422 = arith.index_cast %366 : i32 to index
    %c0_227 = arith.constant 0 : index
    %423 = vector.load %arg11[%c5_226, %422, %c0_227] : memref<6x8x32xf32, #tpu.memory_space<vmem>>, vector<1x2x32xf32>
    %424 = vector.shape_cast %423 : vector<1x2x32xf32> to vector<2x32xf32>
    %cst_228 = arith.constant dense<0.000000e+00> : vector<2x32xf32>
    %425 = tpu.matmul %415, %46, %cst_228 {dimension_numbers = #tpu.dot_dimension_numbers<[1], [0], [0], [1], [0, 0, 1, 1], [], []>} : vector<2x32xf32>, vector<32x32xf32>, vector<2x32xf32> -> vector<2x32xf32>
    %426 = vector.broadcast %58 : vector<1x32xf32> to vector<2x32xf32>
    %427 = arith.addf %425, %426 : vector<2x32xf32>
    %cst_229 = arith.constant dense<0.000000e+00> : vector<2x32xf32>
    %428 = tpu.matmul %415, %48, %cst_229 {dimension_numbers = #tpu.dot_dimension_numbers<[1], [0], [0], [1], [0, 0, 1, 1], [], []>} : vector<2x32xf32>, vector<32x32xf32>, vector<2x32xf32> -> vector<2x32xf32>
    %429 = vector.broadcast %60 : vector<1x32xf32> to vector<2x32xf32>
    %430 = arith.addf %428, %429 : vector<2x32xf32>
    %cst_230 = arith.constant dense<0.000000e+00> : vector<2x32xf32>
    %431 = tpu.matmul %415, %50, %cst_230 {dimension_numbers = #tpu.dot_dimension_numbers<[1], [0], [0], [1], [0, 0, 1, 1], [], []>} : vector<2x32xf32>, vector<32x32xf32>, vector<2x32xf32> -> vector<2x32xf32>
    %432 = vector.broadcast %62 : vector<1x32xf32> to vector<2x32xf32>
    %433 = arith.addf %431, %432 : vector<2x32xf32>
    %434 = arith.addf %418, %427 : vector<2x32xf32>
    %435 = arith.negf %434 : vector<2x32xf32>
    %436 = math.exp %435 : vector<2x32xf32>
    %cst_231 = arith.constant 1.000000e+00 : f32
    %437 = vector.broadcast %cst_231 : f32 to vector<2x32xf32>
    %438 = arith.addf %437, %436 : vector<2x32xf32>
    %439 = arith.divf %437, %438 : vector<2x32xf32>
    %440 = arith.addf %421, %430 : vector<2x32xf32>
    %441 = arith.negf %440 : vector<2x32xf32>
    %442 = math.exp %441 : vector<2x32xf32>
    %cst_232 = arith.constant 1.000000e+00 : f32
    %443 = vector.broadcast %cst_232 : f32 to vector<2x32xf32>
    %444 = arith.addf %443, %442 : vector<2x32xf32>
    %445 = arith.divf %443, %444 : vector<2x32xf32>
    %446 = arith.mulf %439, %433 : vector<2x32xf32>
    %447 = arith.addf %424, %446 : vector<2x32xf32>
    %448 = math.tanh %447 : vector<2x32xf32>
    %cst_233 = arith.constant 1.000000e+00 : f32
    %449 = vector.broadcast %cst_233 : f32 to vector<2x32xf32>
    %450 = arith.subf %449, %445 : vector<2x32xf32>
    %451 = arith.mulf %450, %448 : vector<2x32xf32>
    %452 = arith.mulf %445, %415 : vector<2x32xf32>
    %453 = arith.addf %451, %452 : vector<2x32xf32>
    %c1_234 = arith.constant 1 : index
    %c0_235 = arith.constant 0 : index
    %c0_236 = arith.constant 0 : index
    %454 = vector.load %arg13[%c1_234, %c0_235, %c0_236] : memref<2x2x32xf32, #tpu.memory_space<vmem>>, vector<1x2x32xf32>
    %455 = vector.shape_cast %454 : vector<1x2x32xf32> to vector<2x32xf32>
    %456 = vector.shape_cast %453 : vector<2x32xf32> to vector<1x2x32xf32>
    tpu.vector_store %arg13[%c1_234, %c0_235, %c0_236], %456 {strides = array<i32>} : memref<2x2x32xf32, #tpu.memory_space<vmem>>, vector<1x2x32xf32>,
    %c1_237 = arith.constant 1 : index
    %457 = arith.index_cast %366 : i32 to index
    %c0_238 = arith.constant 0 : index
    %458 = vector.load %arg12[%c1_237, %457, %c0_238] : memref<2x8x32xf32, #tpu.memory_space<vmem>>, vector<1x2x32xf32>
    %459 = vector.shape_cast %458 : vector<1x2x32xf32> to vector<2x32xf32>
    %460 = vector.shape_cast %453 : vector<2x32xf32> to vector<1x2x32xf32>
    tpu.vector_store %arg12[%c1_237, %457, %c0_238], %460 {strides = array<i32>} : memref<2x8x32xf32, #tpu.memory_space<vmem>>, vector<1x2x32xf32>,
    %c4_i32 = arith.constant 4 : i32
    %c0_239 = arith.constant 0 : index
    %c0_240 = arith.constant 0 : index
    %c0_241 = arith.constant 0 : index
    %461 = vector.load %arg12[%c0_239, %c0_240, %c0_241] : memref<2x8x32xf32, #tpu.memory_space<vmem>>, vector<1x8x32xf32>
    %462 = vector.shape_cast %461 : vector<1x8x32xf32> to vector<8x32xf32>
    %c0_242 = arith.constant 0 : index
    %c0_243 = arith.constant 0 : index
    %c0_244 = arith.constant 0 : index
    %463 = vector.load %arg8[%c0_242, %c0_243, %c0_244] : memref<2x32x128xf32, #tpu.memory_space<vmem>>, vector<1x32x128xf32>
    %464 = vector.shape_cast %463 : vector<1x32x128xf32> to vector<32x128xf32>
    %cst_245 = arith.constant dense<0.000000e+00> : vector<8x128xf32>
    %465 = tpu.matmul %462, %464, %cst_245 {dimension_numbers = #tpu.dot_dimension_numbers<[1], [0], [0], [1], [0, 0, 1, 1], [], []>} : vector<8x32xf32>, vector<32x128xf32>, vector<8x128xf32> -> vector<8x128xf32>
    %c1_246 = arith.constant 1 : index
    %c0_247 = arith.constant 0 : index
    %c0_248 = arith.constant 0 : index
    %466 = vector.load %arg12[%c1_246, %c0_247, %c0_248] : memref<2x8x32xf32, #tpu.memory_space<vmem>>, vector<1x8x32xf32>
    %467 = vector.shape_cast %466 : vector<1x8x32xf32> to vector<8x32xf32>
    %c1_249 = arith.constant 1 : index
    %c0_250 = arith.constant 0 : index
    %c0_251 = arith.constant 0 : index
    %468 = vector.load %arg8[%c1_249, %c0_250, %c0_251] : memref<2x32x128xf32, #tpu.memory_space<vmem>>, vector<1x32x128xf32>
    %469 = vector.shape_cast %468 : vector<1x32x128xf32> to vector<32x128xf32>
    %cst_252 = arith.constant dense<0.000000e+00> : vector<8x128xf32>
    %470 = tpu.matmul %467, %469, %cst_252 {dimension_numbers = #tpu.dot_dimension_numbers<[1], [0], [0], [1], [0, 0, 1, 1], [], []>} : vector<8x32xf32>, vector<32x128xf32>, vector<8x128xf32> -> vector<8x128xf32>
    %471 = arith.addf %465, %470 : vector<8x128xf32>
    %c0_253 = arith.constant 0 : index
    %c0_254 = arith.constant 0 : index
    %472 = vector.load %arg9[%c0_253, %c0_254] : memref<1x128xf32, #tpu.memory_space<vmem>>, vector<1x128xf32>
    %473 = vector.broadcast %472 : vector<1x128xf32> to vector<8x128xf32>
    %474 = arith.addf %471, %473 : vector<8x128xf32>
    %cst_255 = arith.constant dense<0xFF800000> : vector<8xf32>
    %475 = vector.multi_reduction <maximumf>, %474, %cst_255 [1] : vector<8x128xf32> to vector<8xf32>
    %476 = vector.shape_cast %475 : vector<8xf32> to vector<8x1xf32>
    %477 = vector.broadcast %476 : vector<8x1xf32> to vector<8x128xf32>
    %478 = arith.subf %474, %477 : vector<8x128xf32>
    %479 = math.exp %478 : vector<8x128xf32>
    %cst_256 = arith.constant dense<0.000000e+00> : vector<8xf32>
    %480 = vector.multi_reduction <add>, %479, %cst_256 [1] : vector<8x128xf32> to vector<8xf32>
    %481 = vector.shape_cast %480 : vector<8xf32> to vector<8x1xf32>
    %482 = math.log %481 : vector<8x1xf32>
    %483 = arith.addf %476, %482 : vector<8x1xf32>
    %484 = vector.broadcast %483 : vector<8x1xf32> to vector<8x128xf32>
    %485 = arith.subf %474, %484 : vector<8x128xf32>
    %c0_257 = arith.constant 0 : index
    %c0_258 = arith.constant 0 : index
    %486 = vector.load %arg10[%c0_257, %c0_258] : memref<8x128xf32, #tpu.memory_space<vmem>>, vector<8x128xf32>
    tpu.vector_store %arg10[%c0_257, %c0_258], %485 {strides = array<i32>} : memref<8x128xf32, #tpu.memory_space<vmem>>, vector<8x128xf32>,
    return
  }
}

</mosaic_0001>

<bundles_post_ra>
// kernel: tile.9
= control target key start
LH: loop header
LB: loop body
LE: loop exit
PB: predicated region body
PF: predicated region fallthrough
CT: control target
= control target key end

     0   :  { %vm7_vm0 = vcmask 130048   ;;  %vm13_vm1 = vcmask 261248   ;;  %s39_s0 = inlined_call_operand.vmem [shape: f32[2,16], index: 0, kind: input, shape index: {}]   ;;  %s40_s1 = inlined_call_operand.vmem [shape: f32[1,32], index: 1, kind: output, shape index: {}]  }
   0x1   :  { %v4_v0 = vld [vmem:[%s39_s0] sm:$0x3]  ;;  %s22_s0 = smov 16  }
   0x2   :  { %5 = vst [vmem:[#allocation1] sm:$0x3] %v4_v0 }
   0x9   :  { %v10_v1 = vld [vmem:[#allocation1 + $0x1] sm:$0x1]   ;;  %v6_v2 = vld [vmem:[#allocation1] sm:$0x1]  }
   0xa   :  { %11 = vrot.lane.b32.xlu0 %v10_v1, %s22_s0  ;;  %8 = vst.msk [vmem:[#allocation0] sm:$0x1] %vm7_vm0, %v6_v2  }
  0x7c   :  { %v12_v3 = vpop.permute.xlu0 %11  }
  0x7d   :  { %14 = vst.msk [vmem:[#allocation0] sm:$0x1] %vm13_vm1, %v12_v3  }
  0x84   :  { %v17_v4 = vld [vmem:[#allocation0] sm:$0x1] }
  0x85   :  { %20 = vst [vmem:[%s40_s1] sm:$0x1] %v17_v4 }

// kernel: tile.8
= control target key start
LH: loop header
LB: loop body
LE: loop exit
PB: predicated region body
PF: predicated region fallthrough
CT: control target
= control target key end

     0   :  { %s22_s0 = inlined_call_operand.vmem [shape: f32[16], index: 0, kind: input, shape index: {}]   ;;  %s23_s1 = inlined_call_operand.vmem [shape: f32[2,16], index: 1, kind: output, shape index: {}]  }
   0x1   :  { %v4_v0 = vld [vmem:[%s22_s0] ss:$0 sm:$0xff] }
   0x2   :  { %5 = vst [vmem:[%s23_s1] sm:$0x3] %v4_v0 }

// kernel: crnn_forward.1
= control target key start
LH: loop header
LB: loop body
LE: loop exit
PB: predicated region body
PF: predicated region fallthrough
CT: control target
= control target key end

     0   :  { %s2355_s0 = inlined_call_operand.vmem [shape: f32[8,384], index: 0, kind: input, shape index: {}]   ;;  %s2356_s1 = inlined_call_operand.vmem [shape: f32[384,32], index: 1, kind: input, shape index: {}]   ;;  %s2357_s2 = inlined_call_operand.vmem [shape: f32[1,32], index: 2, kind: input, shape index: {}]   ;;  %s2358_s3 = inlined_call_operand.vmem [shape: f32[32,32], index: 3, kind: input, shape index: {}]   ;;  %s2359_s4 = inlined_call_operand.vmem [shape: f32[32,192], index: 4, kind: input, shape index: {}]   ;;  %s2360_s5 = inlined_call_operand.vmem [shape: f32[1,192], index: 5, kind: input, shape index: {}]   ;;  %s2361_s6 = inlined_call_operand.vmem [shape: f32[6,32,32], index: 6, kind: input, shape index: {}]   ;;  %s2362_s7 = inlined_call_operand.vmem [shape: f32[6,1,32], index: 7, kind: input, shape index: {}]   ;;  %s2363_s8 = inlined_call_operand.vmem [shape: f32[2,32,128], index: 8, kind: input, shape index: {}]   ;;  %s2364_s9 = inlined_call_operand.vmem [shape: f32[1,128], index: 9, kind: input, shape index: {}]   ;;  %s2365_s10 = inlined_call_operand.hbm [shape: f32[8,128], index: 10, kind: output, shape index: {}]  }
   0x1   :  { %v86_v0 = vld [vmem:[%s2356_s1 + $0x178] sm:$0xff]  ;;  %v85_v2 = vld [vmem:[%s2356_s1 + $0x170] sm:$0xff]  ;;  %v84_v5 = vld [vmem:[%s2356_s1 + $0x168] sm:$0xff] }
   0x2   :  { %v54_v1 = vld [vmem:[%s2356_s1 + $0x78] sm:$0xff]  ;;  %131 = vmatpush.msra.mxu2 %v86_v0  ;;  %v53_v3 = vld [vmem:[%s2356_s1 + $0x70] sm:$0xff]  ;;  %v52_v6 = vld [vmem:[%s2356_s1 + $0x68] sm:$0xff] }
   0x3   :  { %91 = vmatpush.msra.mxu0 %v54_v1  ;;  %v70_v4 = vld [vmem:[%s2356_s1 + $0xf8] sm:$0xff]  ;;  %v69_v7 = vld [vmem:[%s2356_s1 + $0xf0] sm:$0xff]  ;;  %v68_v8 = vld [vmem:[%s2356_s1 + $0xe8] sm:$0xff] }
   0x4   :  { %111 = vmatpush.msra.mxu1 %v70_v4  ;;  %132 = vmatpush.msra.mxu2 %v85_v2  ;;  %v83_v9 = vld [vmem:[%s2356_s1 + $0x160] sm:$0xff]  ;;  %v82_v12 = vld [vmem:[%s2356_s1 + $0x158] sm:$0xff]  ;;  %v81_v15 = vld [vmem:[%s2356_s1 + $0x150] sm:$0xff] }
   0x5   :  { %92 = vmatpush.msra.mxu0 %v53_v3  ;;  %v51_v10 = vld [vmem:[%s2356_s1 + $0x60] sm:$0xff]  ;;  %v50_v13 = vld [vmem:[%s2356_s1 + $0x58] sm:$0xff]  ;;  %v49_v16 = vld [vmem:[%s2356_s1 + $0x50] sm:$0xff] }
   0x6   :  { %112 = vmatpush.msra.mxu1 %v69_v7  ;;  %133 = vmatpush.msra.mxu2 %v84_v5  ;;  %v67_v11 = vld [vmem:[%s2356_s1 + $0xe0] sm:$0xff]  ;;  %v66_v14 = vld [vmem:[%s2356_s1 + $0xd8] sm:$0xff]  ;;  %v65_v17 = vld [vmem:[%s2356_s1 + $0xd0] sm:$0xff] }
   0x7   :  { %93 = vmatpush.msra.mxu0 %v52_v6  ;;  %v80_v18 = vld [vmem:[%s2356_s1 + $0x148] sm:$0xff]  ;;  %v79_v21 = vld [vmem:[%s2356_s1 + $0x140] sm:$0xff]  ;;  %v78_v24 = vld [vmem:[%s2356_s1 + $0x138] sm:$0xff] }
   0x8   :  { %113 = vmatpush.msra.mxu1 %v68_v8  ;;  %134 = vmatpush.msra.mxu2 %v83_v9  ;;  %v48_v19 = vld [vmem:[%s2356_s1 + $0x48] sm:$0xff]  ;;  %v47_v22 = vld [vmem:[%s2356_s1 + $0x40] sm:$0xff]  ;;  %v46_v25 = vld [vmem:[%s2356_s1 + $0x38] sm:$0xff] }
   0x9   :  { %94 = vmatpush.msra.mxu0 %v51_v10  ;;  %v64_v20 = vld [vmem:[%s2356_s1 + $0xc8] sm:$0xff]  ;;  %v63_v23 = vld [vmem:[%s2356_s1 + $0xc0] sm:$0xff]  ;;  %v77_v26 = vld [vmem:[%s2356_s1 + $0x130] sm:$0xff] }
   0xa   :  { %114 = vmatpush.msra.mxu1 %v67_v11  ;;  %135 = vmatpush.msra.mxu2 %v82_v12  ;;  %v45_v27 = vld [vmem:[%s2356_s1 + $0x30] sm:$0xff]  ;;  %v62_v28 = vld [vmem:[%s2356_s1 + $0xb8] sm:$0xff]  ;;  %v76_v29 = vld [vmem:[%s2356_s1 + $0x128] sm:$0xff] }
   0xb   :  { %95 = vmatpush.msra.mxu0 %v50_v13  ;;  %v44_v30 = vld [vmem:[%s2356_s1 + $0x28] sm:$0xff]  ;;  %v61_v31 = vld [vmem:[%s2356_s1 + $0xb0] sm:$0xff]  ;;  %v75_v33 = vld [vmem:[%s2356_s1 + $0x120] sm:$0xff] }
   0xc   :  { %115 = vmatpush.msra.mxu1 %v66_v14  ;;  %136 = vmatpush.msra.mxu2 %v81_v15  ;;  %v60_v32 = vld [vmem:[%s2356_s1 + $0xa8] sm:$0xff]  ;;  %v43_v34 = vld [vmem:[%s2356_s1 + $0x20] sm:$0xff] }
   0xd   :  { %96 = vmatpush.msra.mxu0 %v49_v16 }
   0xe   :  { %116 = vmatpush.msra.mxu1 %v65_v17  ;;  %137 = vmatpush.msra.mxu2 %v80_v18 }
   0xf   :  { %97 = vmatpush.msra.mxu0 %v48_v19 }
  0x10   :  { %117 = vmatpush.msra.mxu1 %v64_v20  ;;  %138 = vmatpush.msra.mxu2 %v79_v21 }
  0x11   :  { %98 = vmatpush.msra.mxu0 %v47_v22 }
  0x12   :  { %118 = vmatpush.msra.mxu1 %v63_v23  ;;  %139 = vmatpush.msra.mxu2 %v78_v24 }
  0x13   :  { %99 = vmatpush.msra.mxu0 %v46_v25 }
  0x14   :  { %119 = vmatpush.msra.mxu1 %v62_v28  ;;  %140 = vmatpush.msra.mxu2 %v77_v26 }
  0x15   :  { %100 = vmatpush.msra.mxu0 %v45_v27 }
  0x16   :  { %120 = vmatpush.msra.mxu1 %v61_v31 }
  0x17   :  { %15 = vsyncpa [#allocation6], 0  ;;  %141 = vmatpush.msra.mxu2 %v76_v29  ;;  %101 = vmatpush.msra.mxu0 %v44_v30  ;;  %v59_v35 = vld [vmem:[%s2356_s1 + $0xa0] sm:$0xff]  ;;  %v74_v36 = vld [vmem:[%s2356_s1 + $0x118] sm:$0xff]  ;;  %vm156_vm0 = vcmask 261120   ;;  %vm302_vm1 = vcmask 254976  }
  0x18   :  { %121 = vmatpush.msra.mxu1 %v60_v32  ;;  %v42_v37 = vld [vmem:[%s2356_s1 + $0x18] sm:$0xff]  ;;  %v73_v39 = vld [vmem:[%s2356_s1 + $0x110] sm:$0xff]  ;;  %v72_v42 = vld [vmem:[%s2356_s1 + $0x108] sm:$0xff]  ;;  %v1614_v7 = vmov 0.0   ;;  %s1617_s17 = smov 64  }
  0x19   :  { %142 = vmatpush.msra.mxu2 %v75_v33  ;;  %102 = vmatpush.msra.mxu0 %v43_v34  ;;  %v58_v38 = vld [vmem:[%s2356_s1 + $0x98] sm:$0xff]  ;;  %v41_v40 = vld [vmem:[%s2356_s1 + $0x10] sm:$0xff]  ;;  %v40_v43 = vld [vmem:[%s2356_s1 + $0x8] sm:$0xff]  ;;  %303 = vst.msk [vmem:[#allocation4] sm:$0x3] %vm302_vm1, %v1614_v7 }
  0x1a   :  { %122 = vmatpush.msra.mxu1 %v59_v35  ;;  %v57_v41 = vld [vmem:[%s2356_s1 + $0x90] sm:$0xff]  ;;  %v56_v44 = vld [vmem:[%s2356_s1 + $0x88] sm:$0xff]  ;;  %v71_v45 = vld [vmem:[%s2356_s1 + $0x100] sm:$0xff]  ;;  %304 = vst.msk [vmem:[#allocation4 + $0x2] sm:$0x3] %vm302_vm1, %v1614_v7 }
  0x1b   :  { %143 = vmatpush.msra.mxu2 %v74_v36  ;;  %103 = vmatpush.msra.mxu0 %v42_v37  ;;  %v39_v46 = vld [vmem:[%s2356_s1] sm:$0xff]  ;;  %v38_v47 = vld [vmem:[%s2355_s0 + $0x10] sm:$0xff]  ;;  %v37_v50 = vld [vmem:[%s2355_s0 + $0x8] sm:$0xff] }
  0x1c   :  { %123 = vmatpush.msra.mxu1 %v58_v38  ;;  %v36_v48 = vld [vmem:[%s2355_s0] sm:$0xff]  ;;  %v155_v51 = vld [vmem:[%s2358_s3 + $0x18] sm:$0xff]  ;;  %v154_v52 = vld [vmem:[%s2358_s3 + $0x10] sm:$0xff] }
  0x1d   :  { %144 = vmatpush.msra.mxu2 %v73_v39  ;;  %104 = vmatpush.msra.mxu0 %v41_v40  ;;  %v55_v49 = vld [vmem:[%s2356_s1 + $0x80] sm:$0xff]  ;;  %v153_v53 = vld [vmem:[%s2358_s3 + $0x8] sm:$0xff]  ;;  %v186_v55 = vld [vmem:[%s2359_s4 + $0x30] sm:$0xff]  ;;  %s1618_s1 = smov [#allocation5]  }
  0x1e   :  { %124 = vmatpush.msra.mxu1 %v57_v41  ;;  %172 = vmatpush.msra.mxu3 %v155_v51  ;;  %v152_v54 = vld [vmem:[%s2358_s3] sm:$0xff]  ;;  %v182_v57 = vld [vmem:[%s2359_s4 + $0x10] sm:$0xff]  ;;  %v187_v3 = vld [vmem:[%s2359_s4 + $0x38] sm:$0xff]  ;;  %s1382_s19 = sshll.u32 %s1618_s1, 4  ;;  %s1383_s19 = int_to_ptr.vmem [resolvable:$true] %s1382_s19 }
  0x1f   :  { %145 = vmatpush.msra.mxu2 %v72_v42  ;;  %105 = vmatpush.msra.mxu0 %v40_v43  ;;  %v184_v56 = vld [vmem:[%s2359_s4 + $0x20] sm:$0xff]  ;;  %v185_v4 = vld [vmem:[%s2359_s4 + $0x28] sm:$0xff]  ;;  %v183_v5 = vld [vmem:[%s2359_s4 + $0x18] sm:$0xff] }
  0x20   :  { %125 = vmatpush.msra.mxu1 %v56_v44  ;;  %173 = vmatpush.msra.mxu3 %v154_v52  ;;  %v180_v58 = vld [vmem:[%s2359_s4] sm:$0xff]  ;;  %v181_v6 = vld [vmem:[%s2359_s4 + $0x8] sm:$0xff]  ;;  %v1872_v8 = vld [vmem:[%s2361_s6 + $0x58] sm:$0xff] }
  0x21   :  { %146 = vmatpush.msra.mxu2 %v71_v45  ;;  %106 = vmatpush.msra.mxu0 %v39_v46  ;;  %v1496_v59 = vld [vmem:[%s2357_s2] ss:$0 sm:$0xff]  ;;  %v1877_v9 = vld [vmem:[%s2361_s6 + $0x50] sm:$0xff]  ;;  %v1883_v10 = vld [vmem:[%s2361_s6 + $0x78] sm:$0xff] }
  0x22   :  { %147 = vmatmul.f32.vlgmr.msra.gmra.mxu2 %v38_v47  ;;  %107 = vmatmul.f32.vlgmr.msra.gmra.mxu0 %v36_v48  ;;  %v1888_v11 = vld [vmem:[%s2361_s6 + $0x70] sm:$0xff]  ;;  %v1893_v12 = vld [vmem:[%s2361_s6 + $0x48] sm:$0xff]  ;;  %v1899_v13 = vld [vmem:[%s2361_s6 + $0x38] sm:$0xff] }
  0x23   :  { %126 = vmatpush.msra.mxu1 %v55_v49  ;;  %174 = vmatpush.msra.mxu3 %v153_v53  ;;  %v1905_v14 = vld [vmem:[%s2361_s6 + $0x68] sm:$0xff]  ;;  %v1911_v15 = vld [vmem:[%s2361_s6 + $0x40] sm:$0xff]  ;;  %v1918_v16 = vld [vmem:[%s2361_s6 + $0x18] sm:$0xff] }
  0x24   :  { %127 = vmatmul.f32.vlgmr.msra.gmra.mxu1 %v37_v50  ;;  %463 = vmatpush.msrb.mxu2 %v1883_v10  ;;  %v1924_v17 = vld [vmem:[%s2361_s6 + $0x60] sm:$0xff]  ;;  %v1933_v20 = vld [vmem:[%s2361_s6 + $0x10] sm:$0xff]  ;;  %v1944_v22 = vld [vmem:[%s2361_s6 + $0x8] sm:$0xff] }
  0x25   :  { %175 = vmatpush.msra.mxu3 %v152_v54  ;;  %377 = vmatpush.msrb.mxu1 %v1872_v8  ;;  %v1926_v19 = vld [vmem:[#allocation4] sm:$0x3]  ;;  %v1938_v21 = vld [vmem:[#allocation4 + $0x2] sm:$0x3]  ;;  %v1961_v24 = vld [vmem:[%s2361_s6 + $0x98] sm:$0xff] }
  0x26   :  { %354 = vmatpush.msrb.mxu0 %v1899_v13  ;;  %464 = vmatpush.msrb.mxu2 %v1888_v11  ;;  %v1954_v23 = vld [vmem:[%s2361_s6] sm:$0xff]  ;;  %v1969_v25 = vld [vmem:[%s2361_s6 + $0x90] sm:$0xff]  ;;  %v1977_v26 = vld [vmem:[%s2361_s6 + $0x88] sm:$0xff] }
  0x27   :  { %209 = vmatpush.msrb.mxu3 %v186_v55  ;;  %378 = vmatpush.msrb.mxu1 %v1877_v9  ;;  %v1984_v27 = vld [vmem:[%s2361_s6 + $0x80] sm:$0xff]  ;;  %v2005_v28 = vld [vmem:[%s2361_s6 + $0x30] sm:$0xff]  ;;  %v2012_v29 = vld [vmem:[%s2361_s6 + $0x28] sm:$0xff] }
  0x28   :  { %465 = vmatpush.msrb.mxu2 %v1905_v14  ;;  %355 = vmatpush.msrb.mxu0 %v2005_v28  ;;  %v2018_v30 = vld [vmem:[%s2361_s6 + $0x20] sm:$0xff]  ;;  %v2028_v31 = vld [vmem:[%s2361_s6 + $0xb8] sm:$0xff]  ;;  %v2035_v32 = vld [vmem:[%s2361_s6 + $0xb0] sm:$0xff] }
  0x29   :  { %210 = vmatpush.msrb.mxu3 %v184_v56  ;;  %379 = vmatpush.msrb.mxu1 %v1893_v12  ;;  %v2042_v33 = vld [vmem:[%s2361_s6 + $0xa8] sm:$0xff]  ;;  %v188_v34 = vld [vmem:[%s2360_s5] sm:$0x3]  ;;  %s1615_s5 = smov 32   ;;  %v2077_v47 = vld [vmem:[%s2362_s7 + $0x4] ss:$0 sm:$0xff] }
  0x2a   :  { %466 = vmatpush.msrb.mxu2 %v1924_v17  ;;  %356 = vmatpush.msrb.mxu0 %v2012_v29  ;;  %v2052_v35 = vld [vmem:[%s2361_s6 + $0xa0] sm:$0xff]  ;;  %v190_v36 = vperm.slane %v188_v34, 0  ;;  %v191_v39 = vperm.slane %v188_v34, 1  ;;  %s1616_s6 = smov 96  }
  0x2b   :  { %211 = vmatpush.msrb.mxu3 %v182_v57  ;;  %380 = vmatpush.msrb.mxu1 %v1911_v15  ;;  %v2071_v42 = vld [vmem:[%s2362_s7] ss:$0 sm:$0xff]  ;;  %v2084_v56 = vld [vmem:[%s2362_s7 + $0x3] ss:$0 sm:$0xff] }
  0x2c   :  { %1447 = vmatmul.msk.f32.vlgmr.msrb.gmra.mxu1 %vm156_vm0, %v1926_v19  ;;  %1450 = vmatmul.msk.f32.vlgmr.msrb.gmra.mxu2 %vm156_vm0, %v1938_v21 }
  0x2d   :  { %212 = vmatpush.msrb.mxu3 %v180_v58  ;;  %592 = vmatpush.msra.mxu1 %v1918_v16 }
  0x2e   :  { %612 = vmatpush.msra.mxu2 %v1899_v13  ;;  %357 = vmatpush.msrb.mxu0 %v2018_v30 }
  0x2f   :  { %593 = vmatpush.msra.mxu1 %v1933_v20  ;;  %1446 = vmatmul.msk.f32.vlgmr.msrb.gmra.mxu0 %vm156_vm0, %v1926_v19 }
  0x30   :  { %613 = vmatpush.msra.mxu2 %v2005_v28  ;;  %509 = vmatpush.msra.mxu0 %v2028_v31 }
  0x31   :  { %594 = vmatpush.msra.mxu1 %v1944_v22 }
  0x32   :  { %614 = vmatpush.msra.mxu2 %v2012_v29  ;;  %510 = vmatpush.msra.mxu0 %v2035_v32 }
  0x33   :  { %595 = vmatpush.msra.mxu1 %v1954_v23 }
  0x34   :  { %615 = vmatpush.msra.mxu2 %v2018_v30  ;;  %511 = vmatpush.msra.mxu0 %v2042_v33 }
  0x35   :  { %735 = vmatpush.msrb.mxu1 %v1961_v24 }
  0x36   :  { %755 = vmatpush.msrb.mxu2 %v2028_v31  ;;  %512 = vmatpush.msra.mxu0 %v2052_v35 }
  0x37   :  { %736 = vmatpush.msrb.mxu1 %v1969_v25  ;;  %1452 = vmatmul.msk.f32.vlgmr.msra.gmra.mxu0 %vm156_vm0, %v1938_v21 }
  0x38   :  { %756 = vmatpush.msrb.mxu2 %v2035_v32  ;;  %715 = vmatpush.msrb.mxu0 %v1883_v10 }
  0x39   :  { %737 = vmatpush.msrb.mxu1 %v1977_v26 }
  0x3a   :  { %757 = vmatpush.msrb.mxu2 %v2042_v33  ;;  %716 = vmatpush.msrb.mxu0 %v1888_v11 }
  0x3b   :  { %738 = vmatpush.msrb.mxu1 %v1984_v27 }
  0x3c   :  { %758 = vmatpush.msrb.mxu2 %v2052_v35  ;;  %717 = vmatpush.msrb.mxu0 %v1905_v14 }
  0x3e   :  { %718 = vmatpush.msrb.mxu0 %v1924_v17 }
  0x40   :  { %857 = vmatpush.msra.mxu0 %v1899_v13 }
  0x42   :  { %858 = vmatpush.msra.mxu0 %v2005_v28 }
  0x44   :  { %859 = vmatpush.msra.mxu0 %v2012_v29 }
  0x46   :  { %860 = vmatpush.msra.mxu0 %v2018_v30 }
  0x9f   :  { %v108_v60 = vpop.f32.mrf.mxu0 }
  0xa0   :  { %v109_v61 = vadd.f32 %v1496_v59, %v108_v60 }
  0xa1   :  { %v128_v62 = vpop.f32.mrf.mxu1 }
  0xa2   :  { %v129_v63 = vadd.f32 %v128_v62, %v109_v61 }
  0xa5   :  { %v148_v0 = vpop.f32.mrf.mxu2 }
  0xa6   :  { %v149_v1 = vadd.f32 %v148_v0, %v129_v63 }
  0xa8   :  { %v151_v2 = vmax.f32 %v149_v1, 0.0  ;;  %v2092_v1 = vld [vmem:[%s2362_s7 + $0x1] ss:$0 sm:$0xff] }
  0xaa   :  { %1417 = vmatmul.msk.f32.vlgmr.msra.gmra.mxu3 %vm156_vm0, %v151_v2 }
  0xab   :  { %229 = vmatpush.msra.mxu3 %v187_v3 }
  0xac   :  { %v359_v3 = vpop.f32.mrf.mxu0 }
  0xad   :  { %230 = vmatpush.msra.mxu3 %v185_v4 }
  0xaf   :  { %231 = vmatpush.msra.mxu3 %v183_v5  ;;  %v468_v57 = vpop.f32.mrf.mxu2 }
  0xb0   :  { %v469_v59 = vadd.f32 %v2084_v56, %v468_v57  ;;  %v2111_v57 = vld [vmem:[%s2362_s7 + $0x5] ss:$0 sm:$0xff] }
  0xb1   :  { %232 = vmatpush.msra.mxu3 %v181_v6  ;;  %v360_v6 = vadd.f32 %v2092_v1, %v359_v3 }
 0x12d   :  { %v177_v18 = vpop.f32.mrf.mxu3 }
 0x12e   :  { %1418 = vmatmul.msk.f32.vlgmr.msrb.gmra.mxu3 %vm156_vm0, %v177_v18 }
 0x12f   :  { %331 = vmatpush.msrb.mxu3 %v1918_v16 }
 0x131   :  { %332 = vmatpush.msrb.mxu3 %v1933_v20 }
 0x133   :  { %333 = vmatpush.msrb.mxu3 %v1944_v22 }
 0x135   :  { %334 = vmatpush.msrb.mxu3 %v1954_v23 }
 0x136   :  { %1419 = vmatmul.msk.f32.vlgmr.msra.gmra.mxu3 %vm156_vm0, %v177_v18 }
 0x137   :  { %486 = vmatpush.msra.mxu3 %v1961_v24 }
 0x139   :  { %487 = vmatpush.msra.mxu3 %v1969_v25 }
 0x13b   :  { %488 = vmatpush.msra.mxu3 %v1977_v26 }
 0x13d   :  { %489 = vmatpush.msra.mxu3 %v1984_v27 }
 0x13e   :  { %1445 = vmatmul.msk.f32.vlgmr.msrb.gmra.mxu3 %vm156_vm0, %v1926_v19 }
 0x13f   :  { %632 = vmatpush.msrb.mxu3 %v1872_v8 }
 0x141   :  { %633 = vmatpush.msrb.mxu3 %v1877_v9 }
 0x143   :  { %634 = vmatpush.msrb.mxu3 %v1893_v12 }
 0x145   :  { %635 = vmatpush.msrb.mxu3 %v1911_v15 }
 0x146   :  { %1451 = vmatmul.msk.f32.vlgmr.msra.gmra.mxu3 %vm156_vm0, %v1938_v21 }
 0x147   :  { %837 = vmatpush.msra.mxu3 %v1918_v16 }
 0x149   :  { %838 = vmatpush.msra.mxu3 %v1933_v20 }
 0x14b   :  { %839 = vmatpush.msra.mxu3 %v1944_v22 }
 0x14d   :  { %840 = vmatpush.msra.mxu3 %v1954_v23 }
 0x1b1   :  { %v214_v37 = vpop.f32.mrf.mxu3 }
 0x1b2   :  { %v215_v38 = vadd.f32 %v214_v37, %v190_v36 }
 0x1b4   :  { %237 = vst.msk [vmem:[#allocation2] sm:$0xff] %vm156_vm0, %v215_v38  ;;  %249 = vrot.lane.b32.xlu0 %v215_v38, %s1615_s5 }
 0x1b9   :  { %v234_v40 = vpop.f32.mrf.mxu3 }
 0x1ba   :  { %v235_v41 = vadd.f32 %v234_v40, %v191_v39 }
 0x1bb   :  { %v306_v45 = vld [vmem:[#allocation2] sm:$0x3] }
 0x1bc   :  { %255 = vst.msk [vmem:[#allocation2 + $0x20] sm:$0xff] %vm156_vm0, %v235_v41  ;;  %257 = vrot.lane.b32.xlu1 %v235_v41, %s1616_s6  ;;  %239 = vrot.lane.b32.xlu0 %v215_v38, %s1616_s6 }
 0x1c1   :  { %v336_v43 = vpop.f32.mrf.mxu3 }
 0x1c2   :  { %v337_v44 = vadd.f32 %v2071_v42, %v336_v43 }
 0x1c3   :  { %v441_v51 = vld [vmem:[#allocation2 + $0x26] sm:$0x3] }
 0x1c4   :  { %244 = vrot.lane.b32.xlu1 %v215_v38, %s1617_s17  ;;  %v385_v46 = vadd.f32 %v337_v44, %v306_v45 }
 0x1c6   :  { %v1448_v49 = vmul.f32 -1.442695, %v385_v46 }
 0x1c8   :  { %1504 = vpow2.f32 %v1448_v49 }
 0x1c9   :  { %v491_v48 = vpop.f32.mrf.mxu3 }
 0x1ca   :  { %v492_v50 = vadd.f32 %v2077_v47, %v491_v48 }
 0x1cc   :  { %v537_v52 = vadd.f32 %v492_v50, %v441_v51 }
 0x1ce   :  { %v1505_v53 = vpop.eup %1504  ;;  %v1454_v54 = vmul.f32 -1.442695, %v537_v52  ;;  %v2106_v52 = vld [vmem:[%s2362_s7 + $0x2] ss:$0 sm:$0xff] }
 0x1cf   :  { %v389_v58 = vadd.f32 1.0, %v1505_v53 }
 0x1d0   :  { %1506 = vpow2.f32 %v1454_v54 }
 0x1d1   :  { %1508 = vrcp.f32 %v389_v58  ;;  %v401_v49 = vand.u32 2147483648, %v389_v58  ;;  %vm395_vm3 = vweird.f32 %v389_v58  ;;  %v399_v53 = vand.u32 2147483647, %v389_v58 }
 0x1d3   :  { %vm400_vm6 = vcmp.eq.f32.partialorder %v399_v53, 8.507059e+37 }
 0x1d6   :  { %v1507_v0 = vpop.eup %1506 }
 0x1d7   :  { %v1509_v4 = vpop.eup %1508  ;;  %v2094_v5 = vadd.f32 1.0, %v1507_v0 }
 0x1d8   :  { %v391_v7 = vmul.f32 %v1509_v4, %v389_v58  ;;  %vm396_vm2 = vweird.f32 %v1509_v4 }
 0x1d9   :  { %vm397_vm4 = vmor %vm395_vm3, %vm396_vm2  ;;  %vm547_vm11 = vweird.f32 %v2094_v5 }
 0x1da   :  { %v392_v38 = vsub.f32 1.0, %v391_v7 }
 0x1dc   :  { %v393_v43 = vmul.f32 %v1509_v4, %v392_v38 }
 0x1de   :  { %v394_v46 = vadd.f32 %v1509_v4, %v393_v43 }
 0x226   :  { %v250_v55 = vpop.permute.xlu0 %249 }
 0x227   :  { %253 = vst.msk [vmem:[#allocation2 + $0x18] sm:$0xff] %vm156_vm0, %v250_v55  ;;  %v382_v55 = vpop.f32.mrf.mxu1 }
 0x228   :  { %v383_v58 = vadd.f32 %v2106_v52, %v382_v55 }
 0x22e   :  { %v438_v60 = vld [vmem:[#allocation2 + $0x1e] sm:$0x3]  ;;  %v258_v61 = vpop.permute.xlu1 %257  ;;  %v240_v62 = vpop.permute.xlu0 %239 }
 0x22f   :  { %v517_v63 = vadd.f32 %v469_v59, %v438_v60  ;;  %261 = vst.msk [vmem:[#allocation2 + $0x28] sm:$0xff] %vm156_vm0, %v258_v61  ;;  %v398_v60 = vsel %vm397_vm4, %v1509_v4, %v394_v46  ;;  %v514_v61 = vpop.f32.mrf.mxu0  ;;  %v553_v4 = vand.u32 2147483648, %v2094_v5 }
 0x230   :  { %243 = vst.msk [vmem:[#allocation2 + $0x8] sm:$0xff] %vm156_vm0, %v240_v62  ;;  %v515_v7 = vadd.f32 %v2111_v57, %v514_v61 }
 0x231   :  { %v1453_v2 = vmul.f32 -1.442695, %v517_v63  ;;  %v402_v63 = vor.u32 1.1754944e-38, %v401_v49 }
 0x233   :  { %1510 = vpow2.f32 %v1453_v2 }
 0x234   :  { %1512 = vrcp.f32 %v2094_v5 }
 0x236   :  { %v245_v18 = vpop.permute.xlu1 %244 }
 0x237   :  { %v309_v34 = vld [vmem:[#allocation2 + $0x8] sm:$0x3]  ;;  %248 = vst.msk [vmem:[#allocation2 + $0x10] sm:$0xff] %vm156_vm0, %v245_v18 }
 0x238   :  { %v405_v36 = vadd.f32 %v360_v6, %v309_v34  ;;  %v403_v6 = vsel %vm400_vm6, %v402_v63, %v398_v60 }
 0x239   :  { %v1511_v37 = vpop.eup %1510 }
 0x23a   :  { %v521_v39 = vadd.f32 1.0, %v1511_v37  ;;  %v1449_v40 = vmul.f32 -1.442695, %v405_v36  ;;  %v2099_v41 = vpop.eup %1512 }
 0x23b   :  { %v543_v44 = vmul.f32 %v2099_v41, %v2094_v5  ;;  %vm548_vm10 = vweird.f32 %v2099_v41 }
 0x23c   :  { %1514 = vrcp.f32 %v521_v39  ;;  %v533_v62 = vand.u32 2147483648, %v521_v39  ;;  %v531_v2 = vand.u32 2147483647, %v521_v39  ;;  %vm527_vm7 = vweird.f32 %v521_v39  ;;  %vm549_vm12 = vmor %vm547_vm11, %vm548_vm10 }
 0x23d   :  { %1516 = vpow2.f32 %v1449_v40  ;;  %v544_v51 = vsub.f32 1.0, %v543_v44  ;;  %v425_v40 = vmul.f32 %v403_v6, %v383_v58 }
 0x23e   :  { %v534_v34 = vor.u32 1.1754944e-38, %v533_v62  ;;  %v312_v36 = vld [vmem:[#allocation2 + $0x10] sm:$0x3]  ;;  %vm532_vm9 = vcmp.eq.f32.partialorder %v531_v2, 8.507059e+37 }
 0x23f   :  { %v545_v3 = vmul.f32 %v2099_v41, %v544_v51  ;;  %v426_v49 = vadd.f32 %v425_v40, %v312_v36 }
 0x241   :  { %v546_v44 = vadd.f32 %v2099_v41, %v545_v3 }
 0x242   :  { %v1515_v45 = vpop.eup %1514 }
 0x243   :  { %v1517_v48 = vpop.eup %1516  ;;  %v523_v50 = vmul.f32 %v1515_v45, %v521_v39  ;;  %vm528_vm5 = vweird.f32 %v1515_v45  ;;  %v444_v39 = vld [vmem:[#allocation2 + $0x2e] sm:$0x3] }
 0x244   :  { %v409_v54 = vadd.f32 1.0, %v1517_v48  ;;  %vm529_vm8 = vmor %vm527_vm7, %vm528_vm5 }
 0x245   :  { %v524_v59 = vsub.f32 1.0, %v523_v50  ;;  %v551_v50 = vand.u32 2147483647, %v2094_v5 }
 0x246   :  { %1518 = vrcp.f32 %v409_v54  ;;  %v421_v55 = vand.u32 2147483648, %v409_v54  ;;  %v419_v61 = vand.u32 2147483647, %v409_v54  ;;  %vm415_vm15 = vweird.f32 %v409_v54 }
 0x247   :  { %v525_v0 = vmul.f32 %v1515_v45, %v524_v59  ;;  %v550_v59 = vsel %vm549_vm12, %v2099_v41, %v546_v44  ;;  %vm552_vm14 = vcmp.eq.f32.partialorder %v551_v50, 8.507059e+37 }
 0x248   :  { %vm420_vm3 = vcmp.eq.f32.partialorder %v419_v61, 8.507059e+37 }
 0x249   :  { %v526_v18 = vadd.f32 %v1515_v45, %v525_v0  ;;  %v422_v0 = vor.u32 1.1754944e-38, %v421_v55 }
 0x24b   :  { %v530_v37 = vsel %vm529_vm8, %v1515_v45, %v526_v18  ;;  %v554_v45 = vor.u32 1.1754944e-38, %v553_v4 }
 0x24c   :  { %v1519_v38 = vpop.eup %1518  ;;  %v535_v43 = vsel %vm532_vm9, %v534_v34, %v530_v37 }
 0x24d   :  { %v411_v46 = vmul.f32 %v1519_v38, %v409_v54  ;;  %v557_v48 = vmul.f32 %v535_v43, %v515_v7  ;;  %vm416_vm13 = vweird.f32 %v1519_v38  ;;  %v555_v63 = vsel %vm552_vm14, %v554_v45, %v550_v59  ;;  %v693_v43 = vld [vmem:[#allocation2 + $0x1c] sm:$0x3] }
 0x24e   :  { %vm417_vm2 = vmor %vm415_vm15, %vm416_vm13  ;;  %v560_v3 = vsub.f32 1.0, %v555_v63  ;;  %v562_v41 = vmul.f32 %v555_v63, %v1938_v21 }
 0x24f   :  { %v412_v51 = vsub.f32 1.0, %v411_v46  ;;  %v558_v53 = vadd.f32 %v557_v48, %v444_v39  ;;  %v696_v39 = vld [vmem:[#allocation2 + $0x24] sm:$0x3] }
 0x251   :  { %v413_v60 = vmul.f32 %v1519_v38, %v412_v51  ;;  %1520 = vtanh.f32 %v558_v53 }
 0x252   :  { %1522 = vtanh.f32 %v426_v49 }
 0x253   :  { %v414_v62 = vadd.f32 %v1519_v38, %v413_v60 }
 0x255   :  { %v418_v2 = vsel %vm417_vm2, %v1519_v38, %v414_v62 }
 0x256   :  { %v423_v5 = vsel %vm420_vm3, %v422_v0, %v418_v2 }
 0x257   :  { %v1521_v58 = vpop.eup %1520  ;;  %v428_v6 = vsub.f32 1.0, %v423_v5  ;;  %v430_v34 = vmul.f32 %v423_v5, %v1926_v19 }
 0x258   :  { %v1523_v7 = vpop.eup %1522  ;;  %v561_v18 = vmul.f32 %v1521_v58, %v560_v3 }
 0x259   :  { %v429_v4 = vmul.f32 %v1523_v7, %v428_v6 }
 0x25a   :  { %v563_v36 = vadd.f32 %v562_v41, %v561_v18 }
 0x25b   :  { %v431_v37 = vadd.f32 %v430_v34, %v429_v4 }
 0x25c   :  { %564 = vst.msk [vmem:[#allocation4 + $0x2] sm:$0x3] %vm302_vm1, %v563_v36 }
 0x25d   :  { %432 = vst.msk [vmem:[#allocation4] sm:$0x3] %vm302_vm1, %v431_v37 }
 0x25e   :  { %433 = vst.msk [vmem:[#allocation3] sm:$0x3] %vm302_vm1, %v431_v37 }
 0x25f   :  { %567 = vst.msk [vmem:[#allocation3 + $0xe] sm:$0x3] %vm302_vm1, %v563_v36 }
 0x263   :  { %v2128_v54 = vld [vmem:[#allocation4 + $0x2] sm:$0x3] }
 0x264   :  { %v2130_v38 = vld [vmem:[#allocation4] sm:$0x3]  ;;  %1460 = vmatmul.msk.f32.vlgmr.msrb.gmra.mxu0 %vm156_vm0, %v2128_v54 }
 0x265   :  { %1455 = vmatmul.msk.f32.vlgmr.msra.gmra.mxu1 %vm156_vm0, %v2130_v38  ;;  %1456 = vmatmul.msk.f32.vlgmr.msra.gmra.mxu2 %vm156_vm0, %v2130_v38 }
 0x266   :  { %1457 = vmatmul.msk.f32.vlgmr.msrb.gmra.mxu3 %vm156_vm0, %v2130_v38  ;;  %877 = vmatpush.msra.mxu1 %v1872_v8 }
 0x267   :  { %960 = vmatpush.msra.mxu2 %v1883_v10  ;;  %980 = vmatpush.msrb.mxu3 %v1961_v24 }
 0x268   :  { %878 = vmatpush.msra.mxu1 %v1877_v9  ;;  %1000 = vmatpush.msrb.mxu0 %v2028_v31 }
 0x269   :  { %961 = vmatpush.msra.mxu2 %v1888_v11  ;;  %981 = vmatpush.msrb.mxu3 %v1969_v25 }
 0x26a   :  { %879 = vmatpush.msra.mxu1 %v1893_v12  ;;  %1001 = vmatpush.msrb.mxu0 %v2035_v32 }
 0x26b   :  { %962 = vmatpush.msra.mxu2 %v1905_v14  ;;  %982 = vmatpush.msrb.mxu3 %v1977_v26 }
 0x26c   :  { %880 = vmatpush.msra.mxu1 %v1911_v15  ;;  %1002 = vmatpush.msrb.mxu0 %v2042_v33 }
 0x26d   :  { %1461 = vmatmul.msk.f32.vlgmr.msrb.gmra.mxu1 %vm156_vm0, %v2128_v54  ;;  %1462 = vmatmul.msk.f32.vlgmr.msrb.gmra.mxu2 %vm156_vm0, %v2128_v54 }
 0x26e   :  { %963 = vmatpush.msra.mxu2 %v1924_v17  ;;  %983 = vmatpush.msrb.mxu3 %v1984_v27 }
 0x26f   :  { %1003 = vmatpush.msrb.mxu0 %v2052_v35  ;;  %1081 = vmatpush.msrb.mxu1 %v1918_v16 }
 0x270   :  { %1101 = vmatpush.msrb.mxu2 %v1899_v13  ;;  %v570_v13 = vld [vmem:[#allocation2 + $0x2] sm:$0x3] }
 0x271   :  { %1082 = vmatpush.msrb.mxu1 %v1933_v20 }
 0x272   :  { %1102 = vmatpush.msrb.mxu2 %v2005_v28 }
 0x273   :  { %1083 = vmatpush.msrb.mxu1 %v1944_v22 }
 0x274   :  { %1103 = vmatpush.msrb.mxu2 %v2012_v29 }
 0x275   :  { %1084 = vmatpush.msrb.mxu1 %v1954_v23  ;;  %v573_v23 = vld [vmem:[#allocation2 + $0xa] sm:$0x3] }
 0x276   :  { %1104 = vmatpush.msrb.mxu2 %v2018_v30 }
 0x2e1   :  { %v720_v19 = vpop.f32.mrf.mxu0 }
 0x2e2   :  { %v597_v21 = vpop.f32.mrf.mxu1  ;;  %v721_v40 = vadd.f32 %v2084_v56, %v720_v19 }
 0x2e3   :  { %v598_v16 = vadd.f32 %v2071_v42, %v597_v21 }
 0x2e4   :  { %v763_v44 = vadd.f32 %v721_v40, %v693_v43 }
 0x2e5   :  { %v640_v20 = vadd.f32 %v598_v16, %v570_v13 }
 0x2e6   :  { %v1463_v46 = vmul.f32 -1.442695, %v763_v44 }
 0x2e7   :  { %v1458_v28 = vmul.f32 -1.442695, %v640_v20 }
 0x2e8   :  { %1524 = vpow2.f32 %v1463_v46  ;;  %v617_v22 = vpop.f32.mrf.mxu2 }
 0x2e9   :  { %1526 = vpow2.f32 %v1458_v28  ;;  %v618_v29 = vadd.f32 %v2092_v1, %v617_v22  ;;  %v637_v4 = vpop.f32.mrf.mxu3 }
 0x2ea   :  { %v740_v48 = vpop.f32.mrf.mxu1  ;;  %v638_v20 = vadd.f32 %v2106_v52, %v637_v4 }
 0x2eb   :  { %v660_v30 = vadd.f32 %v618_v29, %v573_v23  ;;  %v741_v49 = vadd.f32 %v2077_v47, %v740_v48 }
 0x2ed   :  { %v1459_v50 = vmul.f32 -1.442695, %v660_v30  ;;  %v783_v51 = vadd.f32 %v741_v49, %v696_v39 }
 0x2ee   :  { %v1525_v53 = vpop.eup %1524 }
 0x2ef   :  { %v1527_v45 = vpop.eup %1526  ;;  %v767_v55 = vadd.f32 1.0, %v1525_v53  ;;  %1528 = vpow2.f32 %v1459_v50  ;;  %v1464_v59 = vmul.f32 -1.442695, %v783_v51 }
 0x2f0   :  { %v644_v60 = vadd.f32 1.0, %v1527_v45  ;;  %v760_v13 = vpop.f32.mrf.mxu2 }
 0x2f1   :  { %1530 = vrcp.f32 %v767_v55  ;;  %v777_v18 = vand.u32 2147483647, %v767_v55  ;;  %v779_v34 = vand.u32 2147483648, %v767_v55  ;;  %vm773_vm8 = vweird.f32 %v767_v55 }
 0x2f2   :  { %1532 = vrcp.f32 %v644_v60  ;;  %v656_v41 = vand.u32 2147483648, %v644_v60  ;;  %v654_v37 = vand.u32 2147483647, %v644_v60  ;;  %vm650_vm6 = vweird.f32 %v644_v60 }
 0x2f3   :  { %1534 = vpow2.f32 %v1464_v59  ;;  %vm778_vm10 = vcmp.eq.f32.partialorder %v777_v18, 8.507059e+37  ;;  %v780_v28 = vor.u32 1.1754944e-38, %v779_v34  ;;  %v761_v39 = vadd.f32 %v2111_v57, %v760_v13 }
 0x2f4   :  { %v657_v46 = vor.u32 1.1754944e-38, %v656_v41  ;;  %vm655_vm11 = vcmp.eq.f32.partialorder %v654_v37, 8.507059e+37 }
 0x2f5   :  { %v1529_v61 = vpop.eup %1528 }
 0x2f6   :  { %v2172_v62 = vadd.f32 1.0, %v1529_v61 }
 0x2f7   :  { %v1531_v63 = vpop.eup %1530 }
 0x2f8   :  { %v1533_v0 = vpop.eup %1532  ;;  %1536 = vrcp.f32 %v2172_v62  ;;  %v769_v3 = vmul.f32 %v1531_v63, %v767_v55  ;;  %vm774_vm5 = vweird.f32 %v1531_v63  ;;  %v676_v30 = vand.u32 2147483648, %v2172_v62  ;;  %v576_v55 = vld [vmem:[#allocation2 + $0x12] sm:$0x3] }
 0x2f9   :  { %v1535_v2 = vpop.eup %1534  ;;  %v646_v5 = vmul.f32 %v1533_v0, %v644_v60  ;;  %vm651_vm4 = vweird.f32 %v1533_v0  ;;  %vm775_vm9 = vmor %vm773_vm8, %vm774_vm5  ;;  %v674_v59 = vand.u32 2147483647, %v2172_v62  ;;  %vm670_vm13 = vweird.f32 %v2172_v62 }
 0x2fa   :  { %v2175_v58 = vadd.f32 1.0, %v1535_v2  ;;  %v770_v7 = vsub.f32 1.0, %v769_v3  ;;  %vm2179_vm7 = vmor %vm650_vm6, %vm651_vm4  ;;  %v699_v2 = vld [vmem:[#allocation2 + $0x2c] sm:$0x3] }
 0x2fb   :  { %v647_v6 = vsub.f32 1.0, %v646_v5  ;;  %v677_v5 = vor.u32 1.1754944e-38, %v676_v30  ;;  %vm675_vm2 = vcmp.eq.f32.partialorder %v674_v59, 8.507059e+37 }
 0x2fc   :  { %1538 = vrcp.f32 %v2175_v58  ;;  %v771_v19 = vmul.f32 %v1531_v63, %v770_v7  ;;  %v799_v3 = vand.u32 2147483648, %v2175_v58  ;;  %vm793_vm3 = vweird.f32 %v2175_v58 }
 0x2fd   :  { %v648_v36 = vmul.f32 %v1533_v0, %v647_v6  ;;  %v797_v6 = vand.u32 2147483647, %v2175_v58 }
 0x2fe   :  { %v1537_v21 = vpop.eup %1536  ;;  %v772_v44 = vadd.f32 %v1531_v63, %v771_v19  ;;  %v800_v4 = vor.u32 1.1754944e-38, %v799_v3 }
 0x2ff   :  { %v666_v40 = vmul.f32 %v1537_v21, %v2172_v62  ;;  %v649_v16 = vadd.f32 %v1533_v0, %v648_v36  ;;  %vm671_vm12 = vweird.f32 %v1537_v21  ;;  %vm798_vm5 = vcmp.eq.f32.partialorder %v797_v6, 8.507059e+37 }
 0x300   :  { %v776_v23 = vsel %vm775_vm9, %v1531_v63, %v772_v44  ;;  %vm672_vm14 = vmor %vm670_vm13, %vm671_vm12 }
 0x301   :  { %v667_v22 = vsub.f32 1.0, %v666_v40  ;;  %v653_v29 = vsel %vm2179_vm7, %v1533_v0, %v649_v16  ;;  %v781_v50 = vsel %vm778_vm10, %v780_v28, %v776_v23  ;;  %v941_v23 = vld [vmem:[#allocation2 + $0x22] sm:$0x3] }
 0x302   :  { %v1539_v48 = vpop.eup %1538  ;;  %v658_v49 = vsel %vm655_vm11, %v657_v46, %v653_v29  ;;  %v803_v60 = vmul.f32 %v781_v50, %v761_v39 }
 0x303   :  { %v668_v51 = vmul.f32 %v1537_v21, %v667_v22  ;;  %v680_v53 = vmul.f32 %v658_v49, %v638_v20  ;;  %v789_v45 = vmul.f32 %v1539_v48, %v2175_v58  ;;  %vm794_vm15 = vweird.f32 %v1539_v48 }
 0x304   :  { %v804_v7 = vadd.f32 %v803_v60, %v699_v2  ;;  %vm795_vm4 = vmor %vm793_vm3, %vm794_vm15 }
 0x305   :  { %v669_v61 = vadd.f32 %v1537_v21, %v668_v51  ;;  %v681_v63 = vadd.f32 %v680_v53, %v576_v55  ;;  %v790_v0 = vsub.f32 1.0, %v789_v45 }
 0x307   :  { %v673_v18 = vsel %vm672_vm14, %v1537_v21, %v669_v61  ;;  %1540 = vtanh.f32 %v681_v63  ;;  %v791_v41 = vmul.f32 %v1539_v48, %v790_v0 }
 0x308   :  { %1542 = vtanh.f32 %v804_v7  ;;  %v678_v34 = vsel %vm675_vm2, %v677_v5, %v673_v18 }
 0x309   :  { %v792_v62 = vadd.f32 %v1539_v48, %v791_v41  ;;  %v683_v37 = vsub.f32 1.0, %v678_v34  ;;  %v685_v21 = vmul.f32 %v678_v34, %v2130_v38 }
 0x30b   :  { %v796_v36 = vsel %vm795_vm4, %v1539_v48, %v792_v62 }
 0x30c   :  { %v801_v19 = vsel %vm798_vm5, %v800_v4, %v796_v36 }
 0x30d   :  { %v1541_v40 = vpop.eup %1540  ;;  %v806_v16 = vsub.f32 1.0, %v801_v19  ;;  %v808_v20 = vmul.f32 %v801_v19, %v2128_v54 }
 0x30e   :  { %v1543_v43 = vpop.eup %1542  ;;  %v684_v13 = vmul.f32 %v1541_v40, %v683_v37 }
 0x30f   :  { %v807_v44 = vmul.f32 %v1543_v43, %v806_v16 }
 0x310   :  { %v686_v46 = vadd.f32 %v685_v21, %v684_v13 }
 0x311   :  { %v809_v28 = vadd.f32 %v808_v20, %v807_v44 }
 0x312   :  { %687 = vst.msk [vmem:[#allocation4] sm:$0x3] %vm302_vm1, %v686_v46 }
 0x313   :  { %689 = vst.msk [vmem:[#allocation3 + $0x2] sm:$0x3] %vm302_vm1, %v686_v46 }
 0x314   :  { %810 = vst.msk [vmem:[#allocation4 + $0x2] sm:$0x3] %vm302_vm1, %v809_v28 }
 0x315   :  { %813 = vst.msk [vmem:[#allocation3 + $0xc] sm:$0x3] %vm302_vm1, %v809_v28 }
 0x319   :  { %v2200_v58 = vld [vmem:[#allocation4] sm:$0x3] }
 0x31a   :  { %1465 = vmatmul.msk.f32.vlgmr.msra.gmra.mxu3 %vm156_vm0, %v2200_v58  ;;  %1466 = vmatmul.msk.f32.vlgmr.msra.gmra.mxu0 %vm156_vm0, %v2200_v58 }
 0x31b   :  { %1467 = vmatmul.msk.f32.vlgmr.msra.gmra.mxu1 %vm156_vm0, %v2200_v58  ;;  %v2208_v54 = vld [vmem:[#allocation4 + $0x2] sm:$0x3]  ;;  %1121 = vmatpush.msra.mxu3 %v1872_v8 }
 0x31c   :  { %1470 = vmatmul.msk.f32.vlgmr.msra.gmra.mxu2 %vm156_vm0, %v2208_v54  ;;  %1204 = vmatpush.msra.mxu0 %v1883_v10  ;;  %v818_v10 = vld [vmem:[#allocation2 + $0xc] sm:$0x3] }
 0x31d   :  { %1122 = vmatpush.msra.mxu3 %v1877_v9  ;;  %1224 = vmatpush.msra.mxu1 %v1961_v24  ;;  %v816_v24 = vld [vmem:[#allocation2 + $0x4] sm:$0x3] }
 0x31e   :  { %1205 = vmatpush.msra.mxu0 %v1888_v11  ;;  %1244 = vmatpush.msra.mxu2 %v2028_v31  ;;  %v938_v31 = vld [vmem:[#allocation2 + $0x1a] sm:$0x3] }
 0x31f   :  { %1123 = vmatpush.msra.mxu3 %v1893_v12  ;;  %1225 = vmatpush.msra.mxu1 %v1969_v25 }
 0x320   :  { %1206 = vmatpush.msra.mxu0 %v1905_v14  ;;  %1245 = vmatpush.msra.mxu2 %v2035_v32 }
 0x321   :  { %1124 = vmatpush.msra.mxu3 %v1911_v15  ;;  %1226 = vmatpush.msra.mxu1 %v1977_v26 }
 0x322   :  { %1471 = vmatmul.msk.f32.vlgmr.msrb.gmra.mxu3 %vm156_vm0, %v2208_v54  ;;  %1472 = vmatmul.msk.f32.vlgmr.msrb.gmra.mxu0 %vm156_vm0, %v2208_v54 }
 0x323   :  { %1207 = vmatpush.msra.mxu0 %v1924_v17  ;;  %1246 = vmatpush.msra.mxu2 %v2042_v33 }
 0x324   :  { %1227 = vmatpush.msra.mxu1 %v1984_v27 }
 0x325   :  { %1247 = vmatpush.msra.mxu2 %v2052_v35 }
 0x397   :  { %v862_v8 = vpop.f32.mrf.mxu0 }
 0x398   :  { %v863_v9 = vadd.f32 %v2092_v1, %v862_v8  ;;  %v882_v2 = vpop.f32.mrf.mxu1 }
 0x399   :  { %v883_v34 = vadd.f32 %v2106_v52, %v882_v2 }
 0x39a   :  { %v905_v11 = vadd.f32 %v863_v9, %v818_v10 }
 0x39c   :  { %v1469_v12 = vmul.f32 -1.442695, %v905_v11 }
 0x39d   :  { %v842_v14 = vpop.f32.mrf.mxu3 }
 0x39e   :  { %1544 = vpow2.f32 %v1469_v12  ;;  %v843_v15 = vadd.f32 %v2071_v42, %v842_v14  ;;  %v821_v14 = vld [vmem:[#allocation2 + $0x14] sm:$0x3] }
 0x39f   :  { %v965_v25 = vpop.f32.mrf.mxu2  ;;  %v1005_v16 = vpop.f32.mrf.mxu0 }
 0x3a0   :  { %v885_v26 = vadd.f32 %v843_v15, %v816_v24  ;;  %v966_v17 = vadd.f32 %v2084_v56, %v965_v25  ;;  %v1006_v9 = vadd.f32 %v2111_v57, %v1005_v16 }
 0x3a2   :  { %v1468_v32 = vmul.f32 -1.442695, %v885_v26  ;;  %v1008_v27 = vadd.f32 %v966_v17, %v938_v31 }
 0x3a4   :  { %v1545_v33 = vpop.eup %1544  ;;  %1546 = vpow2.f32 %v1468_v32  ;;  %v1473_v35 = vmul.f32 -1.442695, %v1008_v27 }
 0x3a5   :  { %v2235_v38 = vadd.f32 1.0, %v1545_v33  ;;  %v985_v22 = vpop.f32.mrf.mxu3 }
 0x3a6   :  { %1548 = vpow2.f32 %v1473_v35  ;;  %v986_v29 = vadd.f32 %v2077_v47, %v985_v22  ;;  %v944_v35 = vld [vmem:[#allocation2 + $0x2a] sm:$0x3] }
 0x3a7   :  { %1550 = vrcp.f32 %v2235_v38  ;;  %v921_v4 = vand.u32 2147483648, %v2235_v38  ;;  %vm915_vm14 = vweird.f32 %v2235_v38  ;;  %v919_v12 = vand.u32 2147483647, %v2235_v38 }
 0x3a8   :  { %v1028_v48 = vadd.f32 %v986_v29, %v941_v23 }
 0x3a9   :  { %v922_v32 = vor.u32 1.1754944e-38, %v921_v4  ;;  %vm920_vm5 = vcmp.eq.f32.partialorder %v919_v12, 8.507059e+37  ;;  %v1304_v12 = vld [vmem:[%s2363_s8 + $0x8] sm:$0xff] }
 0x3aa   :  { %v1547_v30 = vpop.eup %1546  ;;  %v1474_v49 = vmul.f32 -1.442695, %v1028_v48 }
 0x3ab   :  { %v889_v39 = vadd.f32 1.0, %v1547_v30 }
 0x3ac   :  { %v1549_v50 = vpop.eup %1548  ;;  %1552 = vpow2.f32 %v1474_v49 }
 0x3ad   :  { %1554 = vrcp.f32 %v889_v39  ;;  %v2239_v51 = vpop.eup %1550  ;;  %v1012_v53 = vadd.f32 1.0, %v1549_v50  ;;  %v901_v3 = vand.u32 2147483648, %v889_v39  ;;  %v899_v18 = vand.u32 2147483647, %v889_v39 }
 0x3ae   :  { %v911_v45 = vmul.f32 %v2239_v51, %v2235_v38  ;;  %vm895_vm7 = vweird.f32 %v889_v39  ;;  %vm916_vm10 = vweird.f32 %v2239_v51 }
 0x3af   :  { %1556 = vrcp.f32 %v1012_v53  ;;  %v1024_v37 = vand.u32 2147483648, %v1012_v53  ;;  %v902_v40 = vor.u32 1.1754944e-38, %v901_v3  ;;  %v1022_v13 = vand.u32 2147483647, %v1012_v53  ;;  %vm2257_vm2 = vmor %vm915_vm14, %vm916_vm10 }
 0x3b0   :  { %v912_v63 = vsub.f32 1.0, %v911_v45  ;;  %vm900_vm11 = vcmp.eq.f32.partialorder %v899_v18, 8.507059e+37  ;;  %vm1018_vm12 = vweird.f32 %v1012_v53 }
 0x3b1   :  { %v1025_v10 = vor.u32 1.1754944e-38, %v1024_v37  ;;  %vm1023_vm15 = vcmp.eq.f32.partialorder %v1022_v13, 8.507059e+37  ;;  %v1062_v37 = vld [vmem:[#allocation2 + $0xe] sm:$0x3] }
 0x3b2   :  { %v1553_v55 = vpop.eup %1552  ;;  %v913_v41 = vmul.f32 %v2239_v51, %v912_v63 }
 0x3b3   :  { %v1555_v59 = vpop.eup %1554  ;;  %v2243_v60 = vadd.f32 1.0, %v1553_v55 }
 0x3b4   :  { %v891_v61 = vmul.f32 %v1555_v59, %v889_v39  ;;  %vm896_vm6 = vweird.f32 %v1555_v59  ;;  %v914_v20 = vadd.f32 %v2239_v51, %v913_v41  ;;  %v1182_v41 = vld [vmem:[#allocation2 + $0x18] sm:$0x3] }
 0x3b5   :  { %1558 = vrcp.f32 %v2243_v60  ;;  %v1557_v0 = vpop.eup %1556  ;;  %vm897_vm8 = vmor %vm895_vm7, %vm896_vm6  ;;  %v1044_v33 = vand.u32 2147483648, %v2243_v60  ;;  %vm1038_vm4 = vweird.f32 %v2243_v60  ;;  %v1042_v22 = vand.u32 2147483647, %v2243_v60 }
 0x3b6   :  { %v892_v5 = vsub.f32 1.0, %v891_v61  ;;  %v1014_v6 = vmul.f32 %v1557_v0, %v1012_v53  ;;  %vm1019_vm9 = vweird.f32 %v1557_v0  ;;  %v918_v31 = vsel %vm2257_vm2, %v2239_v51, %v914_v20 }
 0x3b7   :  { %vm1020_vm13 = vmor %vm1018_vm12, %vm1019_vm9  ;;  %v923_v23 = vsel %vm920_vm5, %v922_v32, %v918_v31  ;;  %v1045_v30 = vor.u32 1.1754944e-38, %v1044_v33  ;;  %vm1043_vm7 = vcmp.eq.f32.partialorder %v1042_v22, 8.507059e+37 }
 0x3b8   :  { %v893_v7 = vmul.f32 %v1555_v59, %v892_v5  ;;  %v1015_v62 = vsub.f32 1.0, %v1014_v6  ;;  %v928_v49 = vsub.f32 1.0, %v923_v23  ;;  %v930_v51 = vmul.f32 %v923_v23, %v2200_v58  ;;  %v1060_v5 = vld [vmem:[#allocation2 + $0x6] sm:$0x3] }
 0x3ba   :  { %v894_v36 = vadd.f32 %v1555_v59, %v893_v7  ;;  %v1016_v43 = vmul.f32 %v1557_v0, %v1015_v62 }
 0x3bb   :  { %v1559_v19 = vpop.eup %1558 }
 0x3bc   :  { %v898_v21 = vsel %vm897_vm8, %v1555_v59, %v894_v36  ;;  %v1034_v44 = vmul.f32 %v1559_v19, %v2243_v60  ;;  %v1017_v28 = vadd.f32 %v1557_v0, %v1016_v43  ;;  %vm1039_vm3 = vweird.f32 %v1559_v19 }
 0x3bd   :  { %v903_v46 = vsel %vm900_vm11, %v902_v40, %v898_v21  ;;  %vm1040_vm6 = vmor %vm1038_vm4, %vm1039_vm3 }
 0x3be   :  { %v925_v8 = vmul.f32 %v903_v46, %v883_v34  ;;  %v1035_v11 = vsub.f32 1.0, %v1034_v44  ;;  %v1021_v15 = vsel %vm1020_vm13, %v1557_v0, %v1017_v28 }
 0x3bf   :  { %v1026_v26 = vsel %vm1023_vm15, %v1025_v10, %v1021_v15  ;;  %v1305_v10 = vld [vmem:[%s2363_s8 + $0x10] sm:$0xff]  ;;  %v1486_v15 = vld [vmem:[%s2363_s8 + $0x28] sm:$0xff] }
 0x3c0   :  { %v926_v25 = vadd.f32 %v925_v8, %v821_v14  ;;  %v1036_v17 = vmul.f32 %v1559_v19, %v1035_v11  ;;  %v1048_v27 = vmul.f32 %v1026_v26, %v1006_v9  ;;  %v1488_v8 = vld [vmem:[%s2363_s8 + $0x38] sm:$0xff]  ;;  %v1487_v9 = vld [vmem:[%s2363_s8 + $0x30] sm:$0xff]  ;;  %v1303_v26 = vld [vmem:[%s2363_s8] sm:$0xff] }
 0x3c1   :  { %1329 = vmatpush.msrb.mxu3 %v1488_v8 }
 0x3c2   :  { %1560 = vtanh.f32 %v926_v25  ;;  %v1037_v38 = vadd.f32 %v1559_v19, %v1036_v17  ;;  %v1049_v29 = vadd.f32 %v1048_v27, %v944_v35  ;;  %v1485_v17 = vld [vmem:[%s2363_s8 + $0x20] sm:$0xff] }
 0x3c3   :  { %1330 = vmatpush.msrb.mxu3 %v1487_v9 }
 0x3c4   :  { %v1041_v48 = vsel %vm1040_vm6, %v1559_v19, %v1037_v38  ;;  %1562 = vtanh.f32 %v1049_v29 }
 0x3c5   :  { %v1046_v39 = vsel %vm1043_vm7, %v1045_v30, %v1041_v48  ;;  %1331 = vmatpush.msrb.mxu3 %v1486_v15 }
 0x3c6   :  { %v1051_v45 = vsub.f32 1.0, %v1046_v39  ;;  %v1053_v60 = vmul.f32 %v1046_v39, %v2208_v54 }
 0x3c7   :  { %1332 = vmatpush.msrb.mxu3 %v1485_v17 }
 0x3c8   :  { %v1561_v50 = vpop.eup %1560 }
 0x3c9   :  { %v929_v53 = vmul.f32 %v1561_v50, %v928_v49 }
 0x3ca   :  { %v1563_v55 = vpop.eup %1562 }
 0x3cb   :  { %v931_v59 = vadd.f32 %v930_v51, %v929_v53  ;;  %v1052_v61 = vmul.f32 %v1563_v55, %v1051_v45 }
 0x3cd   :  { %934 = vst.msk [vmem:[#allocation3 + $0x4] sm:$0x3] %vm302_vm1, %v931_v59  ;;  %v1054_v63 = vadd.f32 %v1053_v60, %v1052_v61 }
 0x3ce   :  { %932 = vst.msk [vmem:[#allocation4] sm:$0x3] %vm302_vm1, %v931_v59 }
 0x3cf   :  { %1057 = vst.msk [vmem:[#allocation3 + $0xa] sm:$0x3] %vm302_vm1, %v1054_v63 }
 0x3d0   :  { %1055 = vst.msk [vmem:[#allocation4 + $0x2] sm:$0x3] %vm302_vm1, %v1054_v63 }
 0x3d5   :  { %v2273_v0 = vld [vmem:[#allocation4] sm:$0x3] }
 0x3d6   :  { %1475 = vmatmul.msk.f32.vlgmr.msrb.gmra.mxu1 %vm156_vm0, %v2273_v0  ;;  %1476 = vmatmul.msk.f32.vlgmr.msrb.gmra.mxu2 %vm156_vm0, %v2273_v0 }
 0x3d7   :  { %1477 = vmatmul.msk.f32.vlgmr.msra.gmra.mxu3 %vm156_vm0, %v2273_v0  ;;  %v2281_v58 = vld [vmem:[#allocation4 + $0x2] sm:$0x3] }
 0x3d8   :  { %1480 = vmatmul.msk.f32.vlgmr.msra.gmra.mxu0 %vm156_vm0, %v2281_v58 }
 0x3de   :  { %1481 = vmatmul.msk.f32.vlgmr.msra.gmra.mxu1 %vm156_vm0, %v2281_v58  ;;  %1482 = vmatmul.msk.f32.vlgmr.msra.gmra.mxu2 %vm156_vm0, %v2281_v58 }
 0x453   :  { %v1086_v54 = vpop.f32.mrf.mxu1 }
 0x454   :  { %v1087_v2 = vadd.f32 %v2071_v42, %v1086_v54  ;;  %v1185_v42 = vld [vmem:[#allocation2 + $0x20] sm:$0x3] }
 0x455   :  { %v1209_v6 = vpop.f32.mrf.mxu0 }
 0x456   :  { %v1129_v3 = vadd.f32 %v1087_v2, %v1060_v5  ;;  %v1210_v7 = vadd.f32 %v2084_v56, %v1209_v6  ;;  %v1065_v6 = vld [vmem:[#allocation2 + $0x16] sm:$0x3] }
 0x458   :  { %v1478_v18 = vmul.f32 -1.442695, %v1129_v3  ;;  %v1252_v34 = vadd.f32 %v1210_v7, %v1182_v41 }
 0x459   :  { %v1106_v62 = vpop.f32.mrf.mxu2 }
 0x45a   :  { %1564 = vpow2.f32 %v1478_v18  ;;  %v1107_v4 = vadd.f32 %v2092_v1, %v1106_v62  ;;  %v1483_v36 = vmul.f32 -1.442695, %v1252_v34  ;;  %v1126_v32 = vpop.f32.mrf.mxu3 }
 0x45b   :  { %v1229_v19 = vpop.f32.mrf.mxu1  ;;  %v1127_v48 = vadd.f32 %v2106_v52, %v1126_v32 }
 0x45c   :  { %v1149_v40 = vadd.f32 %v1107_v4, %v1062_v37  ;;  %v1230_v16 = vadd.f32 %v2077_v47, %v1229_v19  ;;  %1566 = vpow2.f32 %v1483_v36  ;;  %v1306_v47 = vld [vmem:[%s2363_s8 + $0x18] sm:$0xff] }
 0x45d   :  { %1352 = vmatpush.msrb.mxu0 %v1306_v47 }
 0x45e   :  { %v1479_v43 = vmul.f32 -1.442695, %v1149_v40  ;;  %v1272_v13 = vadd.f32 %v1230_v16, %v1185_v42  ;;  %v1188_v42 = vld [vmem:[#allocation2 + $0x28] sm:$0x3] }
 0x45f   :  { %1353 = vmatpush.msrb.mxu0 %v1305_v10 }
 0x460   :  { %v1565_v21 = vpop.eup %1564  ;;  %1568 = vpow2.f32 %v1479_v43  ;;  %v1484_v56 = vmul.f32 -1.442695, %v1272_v13 }
 0x461   :  { %v1133_v44 = vadd.f32 1.0, %v1565_v21  ;;  %1354 = vmatpush.msrb.mxu0 %v1304_v12  ;;  %v1249_v35 = vpop.f32.mrf.mxu2 }
 0x462   :  { %1570 = vpow2.f32 %v1484_v56  ;;  %v1567_v20 = vpop.eup %1566  ;;  %v1250_v51 = vadd.f32 %v2111_v57, %v1249_v35 }
 0x463   :  { %1572 = vrcp.f32 %v1133_v44  ;;  %v2293_v46 = vadd.f32 1.0, %v1567_v20  ;;  %v1145_v33 = vand.u32 2147483648, %v1133_v44  ;;  %1355 = vmatpush.msrb.mxu0 %v1303_v26  ;;  %v1143_v29 = vand.u32 2147483647, %v1133_v44 }
 0x464   :  { %vm1139_vm9 = vweird.f32 %v1133_v44 }
 0x465   :  { %1574 = vrcp.f32 %v2293_v46  ;;  %v1268_v49 = vand.u32 2147483648, %v2293_v46  ;;  %v1146_v53 = vor.u32 1.1754944e-38, %v1145_v33  ;;  %v1266_v55 = vand.u32 2147483647, %v2293_v46 }
 0x466   :  { %v1569_v1 = vpop.eup %1568  ;;  %vm1144_vm12 = vcmp.eq.f32.partialorder %v1143_v29, 8.507059e+37  ;;  %vm1262_vm13 = vweird.f32 %v2293_v46 }
 0x467   :  { %v2299_v28 = vadd.f32 1.0, %v1569_v1  ;;  %v1269_v2 = vor.u32 1.1754944e-38, %v1268_v49  ;;  %vm1267_vm2 = vcmp.eq.f32.partialorder %v1266_v55, 8.507059e+37 }
 0x468   :  { %v1571_v11 = vpop.eup %1570 }
 0x469   :  { %v1573_v14 = vpop.eup %1572  ;;  %1576 = vrcp.f32 %v2299_v28  ;;  %v2317_v25 = vadd.f32 1.0, %v1571_v11  ;;  %v1165_v57 = vand.u32 2147483648, %v2299_v28  ;;  %v1163_v7 = vand.u32 2147483647, %v2299_v28 }
 0x46a   :  { %v1135_v24 = vmul.f32 %v1573_v14, %v1133_v44  ;;  %vm1140_vm8 = vweird.f32 %v1573_v14  ;;  %vm1159_vm3 = vweird.f32 %v2299_v28 }
 0x46b   :  { %v1575_v31 = vpop.eup %1574  ;;  %1578 = vrcp.f32 %v2317_v25  ;;  %vm1141_vm10 = vmor %vm1139_vm9, %vm1140_vm8  ;;  %v1288_v37 = vand.u32 2147483648, %v2317_v25  ;;  %v1166_v40 = vor.u32 1.1754944e-38, %v1165_v57  ;;  %v1286_v43 = vand.u32 2147483647, %v2317_v25 }
 0x46c   :  { %v1136_v27 = vsub.f32 1.0, %v1135_v24  ;;  %v1258_v38 = vmul.f32 %v1575_v31, %v2293_v46  ;;  %vm1263_vm11 = vweird.f32 %v1575_v31  ;;  %vm1164_vm6 = vcmp.eq.f32.partialorder %v1163_v7, 8.507059e+37 }
 0x46d   :  { %vm1264_vm15 = vmor %vm1262_vm13, %vm1263_vm11  ;;  %vm1282_vm7 = vweird.f32 %v2317_v25  ;;  %v1289_v44 = vor.u32 1.1754944e-38, %v1288_v37  ;;  %vm1287_vm9 = vcmp.eq.f32.partialorder %v1286_v43, 8.507059e+37 }
 0x46e   :  { %v1137_v22 = vmul.f32 %v1573_v14, %v1136_v27  ;;  %v1259_v30 = vsub.f32 1.0, %v1258_v38 }
 0x46f   :  { %v1577_v23 = vpop.eup %1576 }
 0x470   :  { %v1155_v39 = vmul.f32 %v1577_v23, %v2299_v28  ;;  %v1138_v50 = vadd.f32 %v1573_v14, %v1137_v22  ;;  %v1260_v45 = vmul.f32 %v1575_v31, %v1259_v30  ;;  %vm1160_vm14 = vweird.f32 %v1577_v23 }
 0x471   :  { %v1579_v59 = vpop.eup %1578  ;;  %vm1161_vm4 = vmor %vm1159_vm3, %vm1160_vm14 }
 0x472   :  { %v1156_v61 = vsub.f32 1.0, %v1155_v39  ;;  %v1142_v60 = vsel %vm1141_vm10, %v1573_v14, %v1138_v50  ;;  %v1278_v63 = vmul.f32 %v1579_v59, %v2317_v25  ;;  %v1261_v54 = vadd.f32 %v1575_v31, %v1260_v45 }
 0x473   :  { %v1147_v52 = vsel %vm1144_vm12, %v1146_v53, %v1142_v60  ;;  %vm1283_vm5 = vweird.f32 %v1579_v59 }
 0x474   :  { %v1157_v5 = vmul.f32 %v1577_v23, %v1156_v61  ;;  %v1169_v3 = vmul.f32 %v1147_v52, %v1127_v48  ;;  %v1279_v18 = vsub.f32 1.0, %v1278_v63  ;;  %v1265_v41 = vsel %vm1264_vm15, %v1575_v31, %v1261_v54  ;;  %vm1284_vm8 = vmor %vm1282_vm7, %vm1283_vm5 }
 0x475   :  { %v1270_v4 = vsel %vm1267_vm2, %v1269_v2, %v1265_v41 }
 0x476   :  { %v1158_v34 = vadd.f32 %v1577_v23, %v1157_v5  ;;  %v1170_v62 = vadd.f32 %v1169_v3, %v1065_v6  ;;  %v1280_v36 = vmul.f32 %v1579_v59, %v1279_v18  ;;  %v1292_v19 = vmul.f32 %v1270_v4, %v1250_v51 }
 0x478   :  { %v1162_v16 = vsel %vm1161_vm4, %v1577_v23, %v1158_v34  ;;  %1580 = vtanh.f32 %v1170_v62  ;;  %v1281_v13 = vadd.f32 %v1579_v59, %v1280_v36  ;;  %v1293_v21 = vadd.f32 %v1292_v19, %v1188_v42 }
 0x479   :  { %v1167_v56 = vsel %vm1164_vm6, %v1166_v40, %v1162_v16 }
 0x47a   :  { %v1285_v20 = vsel %vm1284_vm8, %v1579_v59, %v1281_v13  ;;  %1582 = vtanh.f32 %v1293_v21  ;;  %v1172_v46 = vsub.f32 1.0, %v1167_v56  ;;  %v1174_v8 = vmul.f32 %v1167_v56, %v2273_v0  ;;  %v1503_v0 = vld [vmem:[%s2364_s9] ss:$0 sm:$0xff]  ;;  %s1384_s9 = sshll.u32 %s2365_s10, 4  ;;  %s1385_s9 = int_to_ptr.hbm [resolvable:$true] %s1384_s9 }
 0x47b   :  { %v1290_v1 = vsel %vm1287_vm9, %v1289_v44, %v1285_v20 }
 0x47c   :  { %v1295_v9 = vsub.f32 1.0, %v1290_v1  ;;  %v1297_v14 = vmul.f32 %v1290_v1, %v2281_v58 }
 0x47e   :  { %v1581_v47 = vpop.eup %1580 }
 0x47f   :  { %v1173_v28 = vmul.f32 %v1581_v47, %v1172_v46 }
 0x480   :  { %v1583_v10 = vpop.eup %1582 }
 0x481   :  { %v1175_v11 = vadd.f32 %v1174_v8, %v1173_v28  ;;  %v1296_v12 = vmul.f32 %v1583_v10, %v1295_v9 }
 0x483   :  { %1176 = vst.msk [vmem:[#allocation4] sm:$0x3] %vm302_vm1, %v1175_v11  ;;  %v1298_v15 = vadd.f32 %v1297_v14, %v1296_v12 }
 0x484   :  { %1178 = vst.msk [vmem:[#allocation3 + $0x6] sm:$0x3] %vm302_vm1, %v1175_v11 }
 0x485   :  { %1299 = vst.msk [vmem:[#allocation4 + $0x2] sm:$0x3] %vm302_vm1, %v1298_v15 }
 0x486   :  { %1301 = vst.msk [vmem:[#allocation3 + $0x8] sm:$0x3] %vm302_vm1, %v1298_v15 }
 0x48b   :  { %v1302_v24 = vld [vmem:[#allocation3] sm:$0xff] }
 0x48c   :  { %1490 = vmatmul.msk.f32.vlgmr.msrb.gmra.mxu0 %vm156_vm0, %v1302_v24 }
 0x48d   :  { %v1308_v25 = vld [vmem:[#allocation3 + $0x8] sm:$0xff] }
 0x48e   :  { %1489 = vmatmul.msk.f32.vlgmr.msrb.gmra.mxu3 %vm156_vm0, %v1308_v25 }
 0x509   :  { %v1357_v58 = vpop.f32.mrf.mxu0 }
 0x511   :  { %v1334_v26 = vpop.f32.mrf.mxu3 }
 0x512   :  { %v1358_v17 = vadd.f32 %v1357_v58, %v1334_v26 }
 0x514   :  { %v1364_v31 = vadd.f32 %v1503_v0, %v1358_v17 }
 0x516   :  { %1365 = vmax.xlane.f32.xlu2 %v1364_v31 }
 0x589   :  { %v1366_v32 = vpop.xlane.xlu2 %1365 }
 0x58a   :  { %v1367_v27 = vsub.f32 %v1364_v31, %v1366_v32 }
 0x58c   :  { %v1368_v33 = vmul.f32 1.442695, %v1367_v27 }
 0x58e   :  { %1584 = vpow2.f32 %v1368_v33 }
 0x594   :  { %v1585_v35 = vpop.eup %1584 }
 0x595   :  { %1370 = vadd.xlane.f32.xlu2 %v1585_v35 }
 0x608   :  { %v1371_v38 = vpop.xlane.xlu2 %1370 }
 0x609   :  { %1586 = vlog2.f32 %v1371_v38 }
 0x60f   :  { %v1587_v22 = vpop.eup %1586 }
 0x610   :  { %v1373_v29 = vmul.f32 0.6931472, %v1587_v22 }
 0x612   :  { %v1374_v23 = vadd.f32 %v1373_v29, %v1366_v32 }
 0x614   :  { %v1375_v48 = vsub.f32 %v1364_v31, %v1374_v23 }
 0x616   :  { %1376 = vst [vmem:[#allocation5] sm:$0xff] %v1375_v48 }
 0x617   :  { %1387 = dma.vmem_to_hbm [thread:$0]  %s1383_s19, 128, %s1385_s9, [#allocation6]  }
 0x618   :  { %1612 = dma.done.wait [#allocation6], 128  }
 0x619   :  { %1613 = vsyncadd [#allocation6], 4294967168 }
 0x61a   :  { %1392 = vsyncpa [#allocation6], 1 }

</bundles_post_ra>
